<compile_context>
chip_gen: v7x
topology: tpu7x:2x2x1
jax: 0.10.0
libtpu: 0.0.40
codegen_flags: <defaults>
</compile_context>

<pallas_src>
import functools

import jax
import jax.numpy as jnp
import numpy as np
from jax.experimental import pallas as pl
from jax.experimental.pallas import tpu as pltpu


def _round_up(x, m):
    return (x + m - 1) // m * m


# ----------------------------------------------------------------------------
# Kernel 1: one-hot embed gather -> +PE -> nx shared residual FFNs -> mean-pool
# ----------------------------------------------------------------------------
def _embed_ffn_pool_kernel(ids_ref, pe_ref, embed_ref, w_ref, b_ref, pool_ref,
                           *, nx, seq, compute_dtype):
    tbs = ids_ref.shape[0]             # tb * seq token rows in this grid step
    vpad, d = embed_ref.shape
    tb = tbs // seq

    # Embedding gather fused in-kernel as a one-hot matmul on the MXU.  This
    # removes the HBM write+read round trip of the (2B, S, D) activation slab.
    # TODO(synk): for large vocabularies replace the one-hot matmul with a
    # manual DMA row-gather (scalar-prefetched ids + make_async_copy).
    ids = ids_ref[...]                                           # (tbs, 1) i32
    iota = jax.lax.broadcasted_iota(jnp.int32, (tbs, vpad), 1)
    onehot = (iota == ids).astype(compute_dtype)                 # (tbs, Vpad)
    t = jnp.dot(onehot, embed_ref[...],
                preferred_element_type=jnp.float32)              # (tbs, d) f32

    # Sinusoidal positional encoding add (VPU filler under the MXU work).
    t = (t.reshape(tb, seq, d) + pe_ref[...]).reshape(tbs, d)

    # nx shared FFN layers with res_connection_add: y = relu(x @ W + b) + x.
    # Residual stream stays f32; only the matmul LHS is cast (weights arrive
    # already in compute_dtype, so there is no per-layer weight cast here).
    for k in range(nx):
        h = jnp.dot(t.astype(compute_dtype), w_ref[k],
                    preferred_element_type=jnp.float32) + b_ref[k]
        t = jnp.maximum(h, 0.0) + t

    # Shared reducer: mean over the sequence axis -> per-step output block.
    pool_ref[...] = t.reshape(tb, seq, d).sum(axis=1) * (1.0 / seq)


def _choose_tb(nrows, seq):
    """Rows per grid step: a multiple of 8 dividing nrows, targeting >= ~512
    token rows per step so the MXU M dimension is filled."""
    want = _round_up(max(8, pl.cdiv(512, seq)), 8)
    tb = min(nrows, want)
    while nrows % tb:
        tb -= 8
    return tb


def embed_ffn_pool(ids_slab, pe, embed_pad, w_stack, b_stack, *, seq, tb=None):
    """ids_slab: (2*Bpad*S, 1) int32, rows [0:Bpad*S]=hypothesis tokens,
    [Bpad*S:]=premise tokens.  Returns pooled (2*Bpad, D) float32."""
    n_tok = ids_slab.shape[0]
    nrows = n_tok // seq
    vpad, d = embed_pad.shape
    nx = w_stack.shape[0]
    if tb is None:
        tb = _choose_tb(nrows, seq)
    assert nrows % tb == 0 and tb % 8 == 0
    grid = (nrows // tb,)
    compute_dtype = embed_pad.dtype

    kernel = functools.partial(_embed_ffn_pool_kernel, nx=nx, seq=seq,
                               compute_dtype=compute_dtype)

    itemsize = jnp.dtype(compute_dtype).itemsize
    flops = 2 * n_tok * vpad * d + nx * 2 * n_tok * d * d + 5 * n_tok * d
    bytes_accessed = (n_tok * 4 + pe.size * 4 + embed_pad.size * itemsize
                      + w_stack.size * itemsize + b_stack.size * 4
                      + nrows * d * 4)

    return pl.pallas_call(
        kernel,
        out_shape=jax.ShapeDtypeStruct((nrows, d), jnp.float32),
        grid_spec=pltpu.PrefetchScalarGridSpec(
            num_scalar_prefetch=0,
            grid=grid,
            in_specs=[
                pl.BlockSpec((tb * seq, 1), lambda i: (i, 0)),   # token ids
                pl.BlockSpec((seq, d), lambda i: (0, 0)),        # pos enc
                pl.BlockSpec((vpad, d), lambda i: (0, 0)),       # embed table
                pl.BlockSpec((nx, d, d), lambda i: (0, 0, 0)),   # FFN W
                pl.BlockSpec((nx, 1, d), lambda i: (0, 0, 0)),   # FFN b
            ],
            out_specs=pl.BlockSpec((tb, d), lambda i: (i, 0)),   # pooled rows
        ),
        # No cross-step state -> grid axis can shard across v7x's 2 TCs.
        compiler_params=pltpu.CompilerParams(
            dimension_semantics=("parallel",)),
        cost_estimate=pl.CostEstimate(
            flops=flops, transcendentals=0, bytes_accessed=bytes_accessed),
    )(ids_slab, pe, embed_pad, w_stack, b_stack)


# ----------------------------------------------------------------------------
# Kernel 2: aggregator epilogue  scores = [h, p, |h-p|, h*p] @ W_cls + b_cls
# ----------------------------------------------------------------------------
def _aggregator_kernel(pool_ref, wcls_ref, bcls_ref, scores_ref,
                       *, batch_pad, compute_dtype):
    pool = pool_ref[...]                   # (2*Bpad, D): [0:Bpad]=h, [Bpad:]=p
    hv = pool[:batch_pad, :]
    pv = pool[batch_pad:, :]
    wc = wcls_ref[...]                     # (4, D, Cpad)
    feats = (hv, pv, jnp.abs(hv - pv), hv * pv)
    scores = bcls_ref[...]                 # (1, Cpad) broadcasts over rows
    for k in range(4):
        scores = scores + jnp.dot(feats[k].astype(compute_dtype), wc[k],
                                  preferred_element_type=jnp.float32)
    scores_ref[...] = scores               # lane-dense (Bpad, Cpad)


def aggregator(pooled, w_cls4, b_cls_pad, *, batch_pad):
    nrows, d = pooled.shape
    cpad = w_cls4.shape[-1]
    compute_dtype = w_cls4.dtype
    kernel = functools.partial(_aggregator_kernel, batch_pad=batch_pad,
                               compute_dtype=compute_dtype)

    itemsize = jnp.dtype(compute_dtype).itemsize
    flops = 4 * 2 * batch_pad * d * cpad
    bytes_accessed = (pooled.size * 4 + w_cls4.size * itemsize
                      + b_cls_pad.size * 4 + batch_pad * cpad * 4)

    return pl.pallas_call(
        kernel,
        out_shape=jax.ShapeDtypeStruct((batch_pad, cpad), jnp.float32),
        grid_spec=pltpu.PrefetchScalarGridSpec(
            num_scalar_prefetch=0,
            grid=(1,),
            in_specs=[
                pl.BlockSpec((nrows, d), lambda i: (0, 0)),
                pl.BlockSpec((4, d, cpad), lambda i: (0, 0, 0)),
                pl.BlockSpec((1, cpad), lambda i: (0, 0)),
            ],
            out_specs=pl.BlockSpec((batch_pad, cpad), lambda i: (0, 0)),
        ),
        compiler_params=pltpu.CompilerParams(
            dimension_semantics=("arbitrary",)),
        cost_estimate=pl.CostEstimate(
            flops=flops, transcendentals=0, bytes_accessed=bytes_accessed),
    )(pooled, w_cls4, b_cls_pad)


# ----------------------------------------------------------------------------
# Glue: positional encoding table, params, forward pass
# ----------------------------------------------------------------------------
def sinusoidal_pos_encoding(seq_len, dim):
    assert dim % 2 == 0, "sinusoidal positional encoding needs even dim"
    pos = np.arange(seq_len)[:, None].astype(np.float32)
    i = np.arange(dim // 2)[None, :].astype(np.float32)
    angle = pos / np.power(10000.0, 2.0 * i / dim)
    pe = np.zeros((seq_len, dim), dtype=np.float32)
    pe[:, 0::2] = np.sin(angle)
    pe[:, 1::2] = np.cos(angle)
    return jnp.asarray(pe)


def init_params(key, vocab_size, dim, num_classes, nx):
    keys = jax.random.split(key, 4)
    embed = jax.random.normal(keys[0], (vocab_size, dim), jnp.float32) * 0.1
    w_stack = jax.random.normal(keys[1], (nx, dim, dim), jnp.float32) * (1.0 / np.sqrt(dim))
    b_stack = jax.random.normal(keys[2], (nx, 1, dim), jnp.float32) * 0.01
    w_cls = jax.random.normal(keys[3], (4, dim, num_classes), jnp.float32) * 0.05
    b_cls = jnp.zeros((1, num_classes), jnp.float32)

    # Lane-friendly padded copies: vocab -> multiple of 128 (one-hot gather),
    # classes -> multiple of 128 (lane-dense classifier output).
    vpad = _round_up(vocab_size, 128)
    cpad = _round_up(num_classes, 128)
    embed_pad = jnp.zeros((vpad, dim), jnp.float32).at[:vocab_size].set(embed)
    w_cls4 = jnp.zeros((4, dim, cpad), jnp.float32).at[..., :num_classes].set(w_cls)
    b_cls_pad = jnp.zeros((1, cpad), jnp.float32).at[..., :num_classes].set(b_cls)
    return dict(embed=embed, embed_pad=embed_pad, w_stack=w_stack,
                b_stack=b_stack, w_cls=w_cls, b_cls=b_cls,
                w_cls4=w_cls4, b_cls_pad=b_cls_pad)


@functools.partial(jax.jit, static_argnames=("use_bf16",))
def model_forward(params, premise_ids, hypothesis_ids, use_bf16=True):
    b, s = premise_ids.shape
    d = params["embed"].shape[1]
    c = params["w_cls"].shape[-1]
    assert s % 8 == 0, "sequence length must be sublane aligned"
    # TODO(synk): non-multiple-of-8 / ragged sequence lengths would need a
    # pooling mask in-kernel; not required by this configuration.

    compute_dtype = jnp.bfloat16 if use_bf16 else jnp.float32
    # Pre-cast the big weight blocks once outside the kernel (halves weight
    # DMA bytes + VMEM residency vs. per-layer in-kernel casts); the f32
    # accumulate / relu / residual / pool epilogue is kept on all generations.
    embed_pad = params["embed_pad"].astype(compute_dtype)
    w_stack = params["w_stack"].astype(compute_dtype)
    w_cls4 = params["w_cls4"].astype(compute_dtype)

    # Both streams share the FFN weights -> process them as one token-id slab,
    # batch padded to a multiple of 8 so all pooled slices are sublane-aligned.
    bpad = _round_up(b, 8)
    hyp = jnp.pad(hypothesis_ids.astype(jnp.int32), ((0, bpad - b), (0, 0)))
    prem = jnp.pad(premise_ids.astype(jnp.int32), ((0, bpad - b), (0, 0)))
    ids_slab = jnp.concatenate([hyp, prem], axis=0).reshape(2 * bpad * s, 1)

    pe = sinusoidal_pos_encoding(s, d)

    pooled = embed_ffn_pool(ids_slab, pe, embed_pad, w_stack,
                            params["b_stack"], seq=s)
    scores_pad = aggregator(pooled, w_cls4, params["b_cls_pad"],
                            batch_pad=bpad)
    return scores_pad[:b, :c]


# Pure-JAX reference for correctness.
def model_forward_ref(params, premise_ids, hypothesis_ids):
    b, s = premise_ids.shape
    d = params["embed"].shape[1]
    pe = sinusoidal_pos_encoding(s, d)
    prem = jnp.take(params["embed"], premise_ids, axis=0) + pe[None]
    hypo = jnp.take(params["embed"], hypothesis_ids, axis=0) + pe[None]
    vectors = {"h": hypo, "p": prem}
    for k in range(params["w_stack"].shape[0]):
        w = params["w_stack"][k]
        bv = params["b_stack"][k]
        for name in ("h", "p"):
            x = vectors[name]
            vectors[name] = jnp.maximum(x @ w + bv, 0.0) + x
    h_pool = jnp.mean(vectors["h"], axis=1)
    p_pool = jnp.mean(vectors["p"], axis=1)
    feats = jnp.concatenate(
        [h_pool, p_pool, jnp.abs(h_pool - p_pool), h_pool * p_pool], axis=-1)
    w_flat = params["w_cls"].reshape(4 * d, -1)
    return feats @ w_flat + params["b_cls"]


if __name__ == "__main__":
    B, S, D, V, C, NX = 2, 8, 128, 64, 4, 2

    key = jax.random.PRNGKey(0)
    k_param, k_prem, k_hypo = jax.random.split(key, 3)
    params = init_params(k_param, V, D, C, NX)

    premise_ids = jax.random.randint(k_prem, (B, S), 0, V, dtype=jnp.int32)
    hypothesis_ids = jax.random.randint(k_hypo, (B, S), 0, V, dtype=jnp.int32)

    ref = jax.block_until_ready(
        model_forward_ref(params, premise_ids, hypothesis_ids))

    # f32 matmul path (tight-tolerance semantics check).
    scores_f32 = jax.block_until_ready(
        model_forward(params, premise_ids, hypothesis_ids, use_bf16=False))
    np.testing.assert_allclose(np.asarray(scores_f32), np.asarray(ref),
                               rtol=1e-3, atol=1e-3)

    # bf16 matmul path (default on all generations; f32 accumulate/epilogue).
    scores = jax.block_until_ready(
        model_forward(params, premise_ids, hypothesis_ids))
    np.testing.assert_allclose(np.asarray(scores), np.asarray(ref),
                               rtol=1e-1, atol=1e-1)

    assert scores.shape == (B, C) and scores.dtype == jnp.float32
    print("KERNEL_OK")
</pallas_src>

<mosaic_0001>
module attributes {stable_mosaic.version = 11 : i64} {
  func.func @_aggregator_kernel(%arg0: i32, %arg1: memref<16x128xf32, #tpu.memory_space<vmem>>, %arg2: memref<4x128x128xf32, #tpu.memory_space<vmem>>, %arg3: memref<1x128xf32, #tpu.memory_space<vmem>>, %arg4: memref<8x128xf32, #tpu.memory_space<vmem>>) attributes {dimension_semantics = [#tpu.dimension_semantics<arbitrary>], iteration_bounds = array<i64: 1>, scalar_prefetch = 0 : i64, scratch_operands = 0 : i64, tpu.core_type = #tpu.core_type<tc>, window_params = [{pipeline_mode = #tpu.pipeline_mode<synchronous>, transform_indices = @transform_0, window_bounds = array<i64: 16, 128>}, {pipeline_mode = #tpu.pipeline_mode<synchronous>, transform_indices = @transform_1, window_bounds = array<i64: 4, 128, 128>}, {pipeline_mode = #tpu.pipeline_mode<synchronous>, transform_indices = @transform_2, window_bounds = array<i64: 1, 128>}, {pipeline_mode = #tpu.pipeline_mode<synchronous>, transform_indices = @transform_3, window_bounds = array<i64: 8, 128>}]} {
    %c0 = arith.constant 0 : index
    %c0_0 = arith.constant 0 : index
    %0 = vector.load %arg1[%c0, %c0_0] : memref<16x128xf32, #tpu.memory_space<vmem>>, vector<16x128xf32>
    %1 = vector.extract_strided_slice %0 {offsets = [0, 0], sizes = [8, 128], strides = [1, 1]} : vector<16x128xf32> to vector<8x128xf32>
    %2 = vector.extract_strided_slice %0 {offsets = [8, 0], sizes = [8, 128], strides = [1, 1]} : vector<16x128xf32> to vector<8x128xf32>
    %c0_1 = arith.constant 0 : index
    %c0_2 = arith.constant 0 : index
    %c0_3 = arith.constant 0 : index
    %3 = vector.load %arg2[%c0_1, %c0_2, %c0_3] : memref<4x128x128xf32, #tpu.memory_space<vmem>>, vector<4x128x128xf32>
    %4 = arith.subf %1, %2 : vector<8x128xf32>
    %5 = math.absf %4 : vector<8x128xf32>
    %6 = arith.mulf %1, %2 : vector<8x128xf32>
    %c0_4 = arith.constant 0 : index
    %c0_5 = arith.constant 0 : index
    %7 = vector.load %arg3[%c0_4, %c0_5] : memref<1x128xf32, #tpu.memory_space<vmem>>, vector<1x128xf32>
    %8 = vector.extract_strided_slice %3 {offsets = [0, 0, 0], sizes = [1, 128, 128], strides = [1, 1, 1]} : vector<4x128x128xf32> to vector<1x128x128xf32>
    %9 = vector.shape_cast %8 : vector<1x128x128xf32> to vector<128x128xf32>
    %cst = arith.constant dense<0.000000e+00> : vector<8x128xf32>
    %10 = tpu.matmul %1, %9, %cst {dimension_numbers = #tpu.dot_dimension_numbers<[1], [0], [0], [1], [0, 0, 1, 1], [], []>} : vector<8x128xf32>, vector<128x128xf32>, vector<8x128xf32> -> vector<8x128xf32>
    %11 = vector.broadcast %7 : vector<1x128xf32> to vector<8x128xf32>
    %12 = arith.addf %11, %10 : vector<8x128xf32>
    %13 = vector.extract_strided_slice %3 {offsets = [1, 0, 0], sizes = [1, 128, 128], strides = [1, 1, 1]} : vector<4x128x128xf32> to vector<1x128x128xf32>
    %14 = vector.shape_cast %13 : vector<1x128x128xf32> to vector<128x128xf32>
    %cst_6 = arith.constant dense<0.000000e+00> : vector<8x128xf32>
    %15 = tpu.matmul %2, %14, %cst_6 {dimension_numbers = #tpu.dot_dimension_numbers<[1], [0], [0], [1], [0, 0, 1, 1], [], []>} : vector<8x128xf32>, vector<128x128xf32>, vector<8x128xf32> -> vector<8x128xf32>
    %16 = arith.addf %12, %15 : vector<8x128xf32>
    %17 = vector.extract_strided_slice %3 {offsets = [2, 0, 0], sizes = [1, 128, 128], strides = [1, 1, 1]} : vector<4x128x128xf32> to vector<1x128x128xf32>
    %18 = vector.shape_cast %17 : vector<1x128x128xf32> to vector<128x128xf32>
    %cst_7 = arith.constant dense<0.000000e+00> : vector<8x128xf32>
    %19 = tpu.matmul %5, %18, %cst_7 {dimension_numbers = #tpu.dot_dimension_numbers<[1], [0], [0], [1], [0, 0, 1, 1], [], []>} : vector<8x128xf32>, vector<128x128xf32>, vector<8x128xf32> -> vector<8x128xf32>
    %20 = arith.addf %16, %19 : vector<8x128xf32>
    %21 = vector.extract_strided_slice %3 {offsets = [3, 0, 0], sizes = [1, 128, 128], strides = [1, 1, 1]} : vector<4x128x128xf32> to vector<1x128x128xf32>
    %22 = vector.shape_cast %21 : vector<1x128x128xf32> to vector<128x128xf32>
    %cst_8 = arith.constant dense<0.000000e+00> : vector<8x128xf32>
    %23 = tpu.matmul %6, %22, %cst_8 {dimension_numbers = #tpu.dot_dimension_numbers<[1], [0], [0], [1], [0, 0, 1, 1], [], []>} : vector<8x128xf32>, vector<128x128xf32>, vector<8x128xf32> -> vector<8x128xf32>
    %24 = arith.addf %20, %23 : vector<8x128xf32>
    %c0_9 = arith.constant 0 : index
    %c0_10 = arith.constant 0 : index
    %25 = vector.load %arg4[%c0_9, %c0_10] : memref<8x128xf32, #tpu.memory_space<vmem>>, vector<8x128xf32>
    tpu.vector_store %arg4[%c0_9, %c0_10], %24 {strides = array<i32>} : memref<8x128xf32, #tpu.memory_space<vmem>>, vector<8x128xf32>,
    return
  }
  func.func @transform_0(%arg0: i32) -> (i32, i32) {
    %c0_i32 = arith.constant 0 : i32
    %c0_i32_0 = arith.constant 0 : i32
    %c0_i32_1 = arith.constant 0 : i32
    return %c0_i32, %c0_i32_0 : i32, i32
  }
  func.func @transform_1(%arg0: i32) -> (i32, i32, i32) {
    %c0_i32 = arith.constant 0 : i32
    %c0_i32_0 = arith.constant 0 : i32
    %c0_i32_1 = arith.constant 0 : i32
    %c0_i32_2 = arith.constant 0 : i32
    return %c0_i32, %c0_i32_0, %c0_i32_1 : i32, i32, i32
  }
  func.func @transform_2(%arg0: i32) -> (i32, i32) {
    %c0_i32 = arith.constant 0 : i32
    %c0_i32_0 = arith.constant 0 : i32
    %c0_i32_1 = arith.constant 0 : i32
    return %c0_i32, %c0_i32_0 : i32, i32
  }
  func.func @transform_3(%arg0: i32) -> (i32, i32) {
    %c0_i32 = arith.constant 0 : i32
    %c0_i32_0 = arith.constant 0 : i32
    %c0_i32_1 = arith.constant 0 : i32
    return %c0_i32, %c0_i32_0 : i32, i32
  }
}

module attributes {stable_mosaic.version = 11 : i64} {
  func.func @_embed_ffn_pool_kernel(%arg0: i32, %arg1: memref<128x1xi32, #tpu.memory_space<vmem>>, %arg2: memref<8x128xf32, #tpu.memory_space<vmem>>, %arg3: memref<128x128xf32, #tpu.memory_space<vmem>>, %arg4: memref<2x128x128xf32, #tpu.memory_space<vmem>>, %arg5: memref<2x1x128xf32, #tpu.memory_space<vmem>>, %arg6: memref<16x128xf32, #tpu.memory_space<vmem>>) attributes {dimension_semantics = [#tpu.dimension_semantics<parallel>], iteration_bounds = array<i64: 1>, scalar_prefetch = 0 : i64, scratch_operands = 0 : i64, tpu.core_type = #tpu.core_type<tc>, window_params = [{transform_indices = @transform_0, window_bounds = array<i64: 128, 1>}, {pipeline_mode = #tpu.pipeline_mode<synchronous>, transform_indices = @transform_1, window_bounds = array<i64: 8, 128>}, {pipeline_mode = #tpu.pipeline_mode<synchronous>, transform_indices = @transform_2, window_bounds = array<i64: 128, 128>}, {pipeline_mode = #tpu.pipeline_mode<synchronous>, transform_indices = @transform_3, window_bounds = array<i64: 2, 128, 128>}, {pipeline_mode = #tpu.pipeline_mode<synchronous>, transform_indices = @transform_4, window_bounds = array<i64: 2, 1, 128>}, {transform_indices = @transform_5, window_bounds = array<i64: 16, 128>}]} {
    %c0 = arith.constant 0 : index
    %c0_0 = arith.constant 0 : index
    %0 = vector.load %arg1[%c0, %c0_0] : memref<128x1xi32, #tpu.memory_space<vmem>>, vector<128x1xi32>
    %1 = tpu.iota {dimensions = array<i32: 1>} : vector<128x128xi32>
    %2 = vector.broadcast %0 : vector<128x1xi32> to vector<128x128xi32>
    %3 = arith.cmpi eq, %1, %2 : vector<128x128xi32>
    %4 = arith.extui %3 : vector<128x128xi1> to vector<128x128xi32>
    %5 = arith.sitofp %4 : vector<128x128xi32> to vector<128x128xf32>
    %c0_1 = arith.constant 0 : index
    %c0_2 = arith.constant 0 : index
    %6 = vector.load %arg3[%c0_1, %c0_2] : memref<128x128xf32, #tpu.memory_space<vmem>>, vector<128x128xf32>
    %cst = arith.constant dense<0.000000e+00> : vector<128x128xf32>
    %7 = tpu.matmul %5, %6, %cst {dimension_numbers = #tpu.dot_dimension_numbers<[1], [0], [0], [1], [0, 0, 1, 1], [], []>} : vector<128x128xf32>, vector<128x128xf32>, vector<128x128xf32> -> vector<128x128xf32>
    %8 = vector.shape_cast %7 : vector<128x128xf32> to vector<16x8x128xf32>
    %c0_3 = arith.constant 0 : index
    %c0_4 = arith.constant 0 : index
    %9 = vector.load %arg2[%c0_3, %c0_4] : memref<8x128xf32, #tpu.memory_space<vmem>>, vector<8x128xf32>
    %10 = vector.shape_cast %9 : vector<8x128xf32> to vector<1x8x128xf32>
    %11 = vector.broadcast %10 : vector<1x8x128xf32> to vector<16x8x128xf32>
    %12 = arith.addf %8, %11 : vector<16x8x128xf32>
    %13 = vector.shape_cast %12 : vector<16x8x128xf32> to vector<128x128xf32>
    %c0_5 = arith.constant 0 : index
    %c0_6 = arith.constant 0 : index
    %c0_7 = arith.constant 0 : index
    %14 = vector.load %arg4[%c0_5, %c0_6, %c0_7] : memref<2x128x128xf32, #tpu.memory_space<vmem>>, vector<1x128x128xf32>
    %15 = vector.shape_cast %14 : vector<1x128x128xf32> to vector<128x128xf32>
    %cst_8 = arith.constant dense<0.000000e+00> : vector<128x128xf32>
    %16 = tpu.matmul %13, %15, %cst_8 {dimension_numbers = #tpu.dot_dimension_numbers<[1], [0], [0], [1], [0, 0, 1, 1], [], []>} : vector<128x128xf32>, vector<128x128xf32>, vector<128x128xf32> -> vector<128x128xf32>
    %c0_9 = arith.constant 0 : index
    %c0_10 = arith.constant 0 : index
    %c0_11 = arith.constant 0 : index
    %17 = vector.load %arg5[%c0_9, %c0_10, %c0_11] : memref<2x1x128xf32, #tpu.memory_space<vmem>>, vector<1x1x128xf32>
    %18 = vector.shape_cast %17 : vector<1x1x128xf32> to vector<1x128xf32>
    %19 = vector.broadcast %18 : vector<1x128xf32> to vector<128x128xf32>
    %20 = arith.addf %16, %19 : vector<128x128xf32>
    %cst_12 = arith.constant 0.000000e+00 : f32
    %21 = vector.broadcast %cst_12 : f32 to vector<128x128xf32>
    %22 = arith.maximumf %20, %21 : vector<128x128xf32>
    %23 = arith.addf %22, %13 : vector<128x128xf32>
    %c1 = arith.constant 1 : index
    %c0_13 = arith.constant 0 : index
    %c0_14 = arith.constant 0 : index
    %24 = vector.load %arg4[%c1, %c0_13, %c0_14] : memref<2x128x128xf32, #tpu.memory_space<vmem>>, vector<1x128x128xf32>
    %25 = vector.shape_cast %24 : vector<1x128x128xf32> to vector<128x128xf32>
    %cst_15 = arith.constant dense<0.000000e+00> : vector<128x128xf32>
    %26 = tpu.matmul %23, %25, %cst_15 {dimension_numbers = #tpu.dot_dimension_numbers<[1], [0], [0], [1], [0, 0, 1, 1], [], []>} : vector<128x128xf32>, vector<128x128xf32>, vector<128x128xf32> -> vector<128x128xf32>
    %c1_16 = arith.constant 1 : index
    %c0_17 = arith.constant 0 : index
    %c0_18 = arith.constant 0 : index
    %27 = vector.load %arg5[%c1_16, %c0_17, %c0_18] : memref<2x1x128xf32, #tpu.memory_space<vmem>>, vector<1x1x128xf32>
    %28 = vector.shape_cast %27 : vector<1x1x128xf32> to vector<1x128xf32>
    %29 = vector.broadcast %28 : vector<1x128xf32> to vector<128x128xf32>
    %30 = arith.addf %26, %29 : vector<128x128xf32>
    %cst_19 = arith.constant 0.000000e+00 : f32
    %31 = vector.broadcast %cst_19 : f32 to vector<128x128xf32>
    %32 = arith.maximumf %30, %31 : vector<128x128xf32>
    %33 = arith.addf %32, %23 : vector<128x128xf32>
    %34 = vector.shape_cast %33 : vector<128x128xf32> to vector<16x8x128xf32>
    %cst_20 = arith.constant dense<0.000000e+00> : vector<16x128xf32>
    %35 = vector.multi_reduction <add>, %34, %cst_20 [1] : vector<16x8x128xf32> to vector<16x128xf32>
    %cst_21 = arith.constant 1.250000e-01 : f32
    %36 = vector.broadcast %cst_21 : f32 to vector<16x128xf32>
    %37 = arith.mulf %35, %36 : vector<16x128xf32>
    %c0_22 = arith.constant 0 : index
    %c0_23 = arith.constant 0 : index
    %38 = vector.load %arg6[%c0_22, %c0_23] : memref<16x128xf32, #tpu.memory_space<vmem>>, vector<16x128xf32>
    tpu.vector_store %arg6[%c0_22, %c0_23], %37 {strides = array<i32>} : memref<16x128xf32, #tpu.memory_space<vmem>>, vector<16x128xf32>,
    return
  }
  func.func @transform_0(%arg0: i32) -> (i32, i32) {
    %c0_i32 = arith.constant 0 : i32
    %c0_i32_0 = arith.constant 0 : i32
    return %arg0, %c0_i32 : i32, i32
  }
  func.func @transform_1(%arg0: i32) -> (i32, i32) {
    %c0_i32 = arith.constant 0 : i32
    %c0_i32_0 = arith.constant 0 : i32
    %c0_i32_1 = arith.constant 0 : i32
    return %c0_i32, %c0_i32_0 : i32, i32
  }
  func.func @transform_2(%arg0: i32) -> (i32, i32) {
    %c0_i32 = arith.constant 0 : i32
    %c0_i32_0 = arith.constant 0 : i32
    %c0_i32_1 = arith.constant 0 : i32
    return %c0_i32, %c0_i32_0 : i32, i32
  }
  func.func @transform_3(%arg0: i32) -> (i32, i32, i32) {
    %c0_i32 = arith.constant 0 : i32
    %c0_i32_0 = arith.constant 0 : i32
    %c0_i32_1 = arith.constant 0 : i32
    %c0_i32_2 = arith.constant 0 : i32
    return %c0_i32, %c0_i32_0, %c0_i32_1 : i32, i32, i32
  }
  func.func @transform_4(%arg0: i32) -> (i32, i32, i32) {
    %c0_i32 = arith.constant 0 : i32
    %c0_i32_0 = arith.constant 0 : i32
    %c0_i32_1 = arith.constant 0 : i32
    %c0_i32_2 = arith.constant 0 : i32
    return %c0_i32, %c0_i32_0, %c0_i32_1 : i32, i32, i32
  }
  func.func @transform_5(%arg0: i32) -> (i32, i32) {
    %c0_i32 = arith.constant 0 : i32
    %c0_i32_0 = arith.constant 0 : i32
    return %arg0, %c0_i32 : i32, i32
  }
}

</mosaic_0001>

<bundles_post_ra>
// kernel: model_forward.3
= control target key start
LH: loop header
LB: loop body
LE: loop exit
PB: predicated region body
PF: predicated region fallthrough
CT: control target
= control target key end

     0   :  { %v693_v0 = vmov 0.0|0.0   ;;  %vm694_vm0 = vmmov 0   ;;  %v695_v8 = vmov 0.0   ;;  %s970_s1 = inlined_call_operand.vmem [shape: f32[4,128,128], index: 1, kind: input, shape index: {}]   ;;  %s971_s0 = inlined_call_operand.vmem [shape: f32[16,128], index: 0, kind: input, shape index: {}]   ;;  %s972_s2 = inlined_call_operand.vmem [shape: f32[1,128], index: 2, kind: input, shape index: {}]   ;;  %s973_s3 = inlined_call_operand.vmem [shape: f32[8,128], index: 3, kind: output, shape index: {}]  }
   0x1   :  { %588 = vmatprep.subr.bf16.mxu1 %v693_v0  ;;  %636 = vmatprep.subr.bf16.mxu0 %v693_v0  ;;  %v16_v1 = vld [vmem:[%s970_s1] sm:$0xff]  ;;  %v17_v2 = vld [vmem:[%s970_s1 + $0x8] sm:$0xff]  ;;  %v18_v6 = vld [vmem:[%s970_s1 + $0x10] sm:$0xff] }
   0x2   :  { %v48_v3 = vld [vmem:[%s970_s1 + $0x100] sm:$0xff]  ;;  %v589_v4 = vpack.c.bf16 %v17_v2, %v16_v1  ;;  %v49_v5 = vld [vmem:[%s970_s1 + $0x108] sm:$0xff]  ;;  %v19_v7 = vld [vmem:[%s970_s1 + $0x18] sm:$0xff]  ;;  %480 = vmatprep.mubr.msk.f32.mxu1 %vm694_vm0, %v695_v8  ;;  %550 = vmatprep.mubr.msk.f32.mxu0 %vm694_vm0, %v695_v8 }
   0x3   :  { %v637_v9 = vpack.c.bf16 %v49_v5, %v48_v3  ;;  %v50_v10 = vld [vmem:[%s970_s1 + $0x110] sm:$0xff]  ;;  %v51_v11 = vld [vmem:[%s970_s1 + $0x118] sm:$0xff]  ;;  %v592_v12 = vpack.c.bf16 %v19_v7, %v18_v6  ;;  %v20_v14 = vld [vmem:[%s970_s1 + $0x20] sm:$0xff] }
   0x4   :  { %590 = vmatpush3.bf16.msra.mxu1 %v589_v4  ;;  %v640_v13 = vpack.c.bf16 %v51_v11, %v50_v10  ;;  %v21_v15 = vld [vmem:[%s970_s1 + $0x28] sm:$0xff]  ;;  %v52_v16 = vld [vmem:[%s970_s1 + $0x120] sm:$0xff]  ;;  %v22_v20 = vld [vmem:[%s970_s1 + $0x30] sm:$0xff] }
   0x5   :  { %638 = vmatpush3.bf16.msra.mxu0 %v637_v9  ;;  %591 = vmatprep.subr.bf16.mxu1 %v693_v0  ;;  %v53_v17 = vld [vmem:[%s970_s1 + $0x128] sm:$0xff]  ;;  %v595_v18 = vpack.c.bf16 %v21_v15, %v20_v14  ;;  %v23_v21 = vld [vmem:[%s970_s1 + $0x38] sm:$0xff]  ;;  %v54_v22 = vld [vmem:[%s970_s1 + $0x130] sm:$0xff] }
   0x6   :  { %639 = vmatprep.subr.bf16.mxu0 %v693_v0  ;;  %v643_v19 = vpack.c.bf16 %v53_v17, %v52_v16  ;;  %v55_v23 = vld [vmem:[%s970_s1 + $0x138] sm:$0xff]  ;;  %v598_v24 = vpack.c.bf16 %v23_v21, %v22_v20  ;;  %v24_v26 = vld [vmem:[%s970_s1 + $0x40] sm:$0xff]  ;;  %v25_v27 = vld [vmem:[%s970_s1 + $0x48] sm:$0xff] }
   0x7   :  { %v646_v25 = vpack.c.bf16 %v55_v23, %v54_v22  ;;  %v56_v28 = vld [vmem:[%s970_s1 + $0x140] sm:$0xff]  ;;  %v57_v29 = vld [vmem:[%s970_s1 + $0x148] sm:$0xff]  ;;  %v601_v30 = vpack.c.bf16 %v25_v27, %v24_v26  ;;  %v26_v32 = vld [vmem:[%s970_s1 + $0x50] sm:$0xff] }
   0x8   :  { %593 = vmatpush3.bf16.msra.mxu1 %v592_v12  ;;  %v649_v31 = vpack.c.bf16 %v57_v29, %v56_v28  ;;  %v27_v33 = vld [vmem:[%s970_s1 + $0x58] sm:$0xff]  ;;  %v58_v34 = vld [vmem:[%s970_s1 + $0x150] sm:$0xff]  ;;  %v28_v38 = vld [vmem:[%s970_s1 + $0x60] sm:$0xff] }
   0x9   :  { %641 = vmatpush3.bf16.msra.mxu0 %v640_v13  ;;  %594 = vmatprep.subr.bf16.mxu1 %v693_v0  ;;  %v59_v35 = vld [vmem:[%s970_s1 + $0x158] sm:$0xff]  ;;  %v604_v36 = vpack.c.bf16 %v27_v33, %v26_v32  ;;  %v29_v39 = vld [vmem:[%s970_s1 + $0x68] sm:$0xff]  ;;  %v60_v40 = vld [vmem:[%s970_s1 + $0x160] sm:$0xff] }
   0xa   :  { %642 = vmatprep.subr.bf16.mxu0 %v693_v0  ;;  %v652_v37 = vpack.c.bf16 %v59_v35, %v58_v34  ;;  %v61_v41 = vld [vmem:[%s970_s1 + $0x168] sm:$0xff]  ;;  %v607_v42 = vpack.c.bf16 %v29_v39, %v28_v38  ;;  %v30_v43 = vld [vmem:[%s970_s1 + $0x70] sm:$0xff]  ;;  %v31_v45 = vld [vmem:[%s970_s1 + $0x78] sm:$0xff] }
   0xb   :  { %v655_v44 = vpack.c.bf16 %v61_v41, %v60_v40  ;;  %v826_v46 = vld [vmem:[%s971_s0] sm:$0xff]  ;;  %v831_v47 = vld [vmem:[%s971_s0 + $0x8] sm:$0xff]  ;;  %v62_v48 = vld [vmem:[%s970_s1 + $0x170] sm:$0xff]  ;;  %v610_v50 = vpack.c.bf16 %v31_v45, %v30_v43 }
   0xc   :  { %596 = vmatpush3.bf16.msra.mxu1 %v595_v18  ;;  %v63_v49 = vld [vmem:[%s970_s1 + $0x178] sm:$0xff]  ;;  %v80_v51 = vsub.f32 %v826_v46, %v831_v47  ;;  %v32_v53 = vld [vmem:[%s970_s1 + $0x80] sm:$0xff]  ;;  %v33_v54 = vld [vmem:[%s970_s1 + $0x88] sm:$0xff]  ;;  %v82_v39 = vmul.f32 %v831_v47, %v826_v46 }
   0xd   :  { %644 = vmatpush3.bf16.msra.mxu0 %v643_v19  ;;  %597 = vmatprep.subr.bf16.mxu1 %v693_v0  ;;  %v658_v52 = vpack.c.bf16 %v63_v49, %v62_v48  ;;  %v64_v55 = vld [vmem:[%s970_s1 + $0x180] sm:$0xff]  ;;  %v65_v56 = vld [vmem:[%s970_s1 + $0x188] sm:$0xff]  ;;  %v613_v57 = vpack.c.bf16 %v33_v54, %v32_v53  ;;  %v34_v60 = vld [vmem:[%s970_s1 + $0x90] sm:$0xff] }
   0xe   :  { %645 = vmatprep.subr.bf16.mxu0 %v693_v0  ;;  %v81_v58 = vand.u32 2147483647, %v80_v51  ;;  %v661_v59 = vpack.c.bf16 %v65_v56, %v64_v55  ;;  %v35_v61 = vld [vmem:[%s970_s1 + $0x98] sm:$0xff]  ;;  %v66_v62 = vld [vmem:[%s970_s1 + $0x190] sm:$0xff]  ;;  %v36_v3 = vld [vmem:[%s970_s1 + $0xa0] sm:$0xff] }
   0xf   :  { %v67_v63 = vld [vmem:[%s970_s1 + $0x198] sm:$0xff]  ;;  %v616_v1 = vpack.c.bf16 %v35_v61, %v34_v60  ;;  %v37_v4 = vld [vmem:[%s970_s1 + $0xa8] sm:$0xff]  ;;  %v68_v5 = vld [vmem:[%s970_s1 + $0x1a0] sm:$0xff] }
  0x10   :  { %599 = vmatpush3.bf16.msra.mxu1 %v598_v24  ;;  %v664_v2 = vpack.c.bf16 %v67_v63, %v66_v62  ;;  %v69_v6 = vld [vmem:[%s970_s1 + $0x1a8] sm:$0xff]  ;;  %v619_v7 = vpack.c.bf16 %v37_v4, %v36_v3  ;;  %v38_v10 = vld [vmem:[%s970_s1 + $0xb0] sm:$0xff]  ;;  %v39_v11 = vld [vmem:[%s970_s1 + $0xb8] sm:$0xff] }
  0x11   :  { %647 = vmatpush3.bf16.msra.mxu0 %v646_v25  ;;  %600 = vmatprep.subr.bf16.mxu1 %v693_v0  ;;  %v667_v9 = vpack.c.bf16 %v69_v6, %v68_v5  ;;  %v71_v12 = vld [vmem:[%s970_s1 + $0x1b8] sm:$0xff]  ;;  %v622_v13 = vpack.c.bf16 %v39_v11, %v38_v10  ;;  %v40_v15 = vld [vmem:[%s970_s1 + $0xc0] sm:$0xff]  ;;  %v41_v16 = vld [vmem:[%s970_s1 + $0xc8] sm:$0xff] }
  0x12   :  { %648 = vmatprep.subr.bf16.mxu0 %v693_v0  ;;  %v72_v17 = vld [vmem:[%s970_s1 + $0x1c0] sm:$0xff]  ;;  %v73_v18 = vld [vmem:[%s970_s1 + $0x1c8] sm:$0xff]  ;;  %v625_v19 = vpack.c.bf16 %v41_v16, %v40_v15  ;;  %v42_v21 = vld [vmem:[%s970_s1 + $0xd0] sm:$0xff] }
  0x13   :  { %v673_v20 = vpack.c.bf16 %v73_v18, %v72_v17  ;;  %v43_v22 = vld [vmem:[%s970_s1 + $0xd8] sm:$0xff]  ;;  %v74_v23 = vld [vmem:[%s970_s1 + $0x1d0] sm:$0xff]  ;;  %v44_v27 = vld [vmem:[%s970_s1 + $0xe0] sm:$0xff] }
  0x14   :  { %602 = vmatpush3.bf16.msra.mxu1 %v601_v30  ;;  %v75_v24 = vld [vmem:[%s970_s1 + $0x1d8] sm:$0xff]  ;;  %v628_v25 = vpack.c.bf16 %v43_v22, %v42_v21  ;;  %v45_v28 = vld [vmem:[%s970_s1 + $0xe8] sm:$0xff]  ;;  %v76_v29 = vld [vmem:[%s970_s1 + $0x1e0] sm:$0xff] }
  0x15   :  { %650 = vmatpush3.bf16.msra.mxu0 %v649_v31  ;;  %603 = vmatprep.subr.bf16.mxu1 %v693_v0  ;;  %v676_v26 = vpack.c.bf16 %v75_v24, %v74_v23  ;;  %v77_v30 = vld [vmem:[%s970_s1 + $0x1e8] sm:$0xff]  ;;  %v631_v31 = vpack.c.bf16 %v45_v28, %v44_v27  ;;  %v46_v33 = vld [vmem:[%s970_s1 + $0xf0] sm:$0xff]  ;;  %v47_v34 = vld [vmem:[%s970_s1 + $0xf8] sm:$0xff] }
  0x16   :  { %651 = vmatprep.subr.bf16.mxu0 %v693_v0  ;;  %v679_v32 = vpack.c.bf16 %v77_v30, %v76_v29  ;;  %v78_v35 = vld [vmem:[%s970_s1 + $0x1f0] sm:$0xff]  ;;  %v379_v40 = vld [vmem:[%s972_s2] ss:$0 sm:$0xff] }
  0x18   :  { %605 = vmatpush3.bf16.msra.mxu1 %v604_v36  ;;  %v79_v36 = vld [vmem:[%s970_s1 + $0x1f8] sm:$0xff] }
  0x19   :  { %653 = vmatpush3.bf16.msra.mxu0 %v652_v37  ;;  %606 = vmatprep.subr.bf16.mxu1 %v693_v0  ;;  %v634_v37 = vpack.c.bf16 %v47_v34, %v46_v33  ;;  %v682_v38 = vpack.c.bf16 %v79_v36, %v78_v35 }
  0x1a   :  { %654 = vmatprep.subr.bf16.mxu0 %v693_v0 }
  0x1c   :  { %608 = vmatpush3.bf16.msra.mxu1 %v607_v42 }
  0x1d   :  { %656 = vmatpush3.bf16.msra.mxu0 %v655_v44  ;;  %609 = vmatprep.subr.bf16.mxu1 %v693_v0 }
  0x1e   :  { %657 = vmatprep.subr.bf16.mxu0 %v693_v0 }
  0x20   :  { %611 = vmatpush3.bf16.msra.mxu1 %v610_v50 }
  0x21   :  { %659 = vmatpush3.bf16.msra.mxu0 %v658_v52  ;;  %612 = vmatprep.subr.bf16.mxu1 %v693_v0 }
  0x22   :  { %660 = vmatprep.subr.bf16.mxu0 %v693_v0 }
  0x23   :  { %481 = vmatmul.mubr.f32.vlgmr.msra.gmra.mrb[0].mxu1 %v826_v46 }
  0x24   :  { %614 = vmatpush3.bf16.msra.mxu1 %v613_v57  ;;  %551 = vmatmul.mubr.f32.vlgmr.msra.gmra.mrb[0].mxu0 %v81_v58 }
  0x25   :  { %662 = vmatpush3.bf16.msra.mxu0 %v661_v59  ;;  %615 = vmatprep.subr.bf16.mxu1 %v693_v0 }
  0x26   :  { %663 = vmatprep.subr.bf16.mxu0 %v693_v0  ;;  %515 = vmatprep.mubr.msk.f32.mxu1 %vm694_vm0, %v695_v8 }
  0x27   :  { %585 = vmatprep.mubr.msk.f32.mxu0 %vm694_vm0, %v695_v8  ;;  %v70_v8 = vld [vmem:[%s970_s1 + $0x1b0] sm:$0xff] }
  0x28   :  { %617 = vmatpush3.bf16.msra.mxu1 %v616_v1  ;;  %v670_v14 = vpack.c.bf16 %v71_v12, %v70_v8 }
  0x29   :  { %665 = vmatpush3.bf16.msra.mxu0 %v664_v2  ;;  %618 = vmatprep.subr.bf16.mxu1 %v693_v0 }
  0x2a   :  { %666 = vmatprep.subr.bf16.mxu0 %v693_v0 }
  0x2c   :  { %620 = vmatpush3.bf16.msra.mxu1 %v619_v7 }
  0x2d   :  { %668 = vmatpush3.bf16.msra.mxu0 %v667_v9  ;;  %621 = vmatprep.subr.bf16.mxu1 %v693_v0 }
  0x2e   :  { %669 = vmatprep.subr.bf16.mxu0 %v693_v0 }
  0x30   :  { %623 = vmatpush3.bf16.msra.mxu1 %v622_v13 }
  0x31   :  { %671 = vmatpush3.bf16.msra.mxu0 %v670_v14  ;;  %624 = vmatprep.subr.bf16.mxu1 %v693_v0 }
  0x32   :  { %672 = vmatprep.subr.bf16.mxu0 %v693_v0 }
  0x34   :  { %626 = vmatpush3.bf16.msra.mxu1 %v625_v19 }
  0x35   :  { %674 = vmatpush3.bf16.msra.mxu0 %v673_v20  ;;  %627 = vmatprep.subr.bf16.mxu1 %v693_v0 }
  0x36   :  { %675 = vmatprep.subr.bf16.mxu0 %v693_v0 }
  0x38   :  { %629 = vmatpush3.bf16.msra.mxu1 %v628_v25 }
  0x39   :  { %677 = vmatpush3.bf16.msra.mxu0 %v676_v26  ;;  %630 = vmatprep.subr.bf16.mxu1 %v693_v0 }
  0x3a   :  { %678 = vmatprep.subr.bf16.mxu0 %v693_v0 }
  0x3c   :  { %632 = vmatpush3.bf16.msra.mxu1 %v631_v31 }
  0x3d   :  { %680 = vmatpush3.bf16.msra.mxu0 %v679_v32  ;;  %633 = vmatprep.subr.bf16.mxu1 %v693_v0 }
  0x3e   :  { %681 = vmatprep.subr.bf16.mxu0 %v693_v0 }
  0x40   :  { %635 = vmatpush3.bf16.msra.mxu1 %v634_v37 }
  0x41   :  { %683 = vmatpush3.bf16.msra.mxu0 %v682_v38 }
  0x43   :  { %516 = vmatmul.mubr.f32.vlgmr.msra.gmra.mrb[0].mxu1 %v831_v47 }
  0x44   :  { %586 = vmatmul.mubr.f32.vlgmr.msra.gmra.mrb[0].mxu0 %v82_v39 }
 0x116   :  { %v227_v41 = vpop.f32.mrb[0].mxu1 }
 0x117   :  { %v684_v42 = vadd.f32 %v379_v40, %v227_v41  ;;  %v369_v43 = vpop.f32.mrb[0].mxu0  ;;  %v517_v44 = vpop.f32.mrb[1].mxu1 }
 0x118   :  { %v587_v45 = vpop.f32.mrb[1].mxu0 }
 0x119   :  { %v685_v48 = vadd.f32 %v684_v42, %v369_v43 }
 0x11b   :  { %374 = vst [vmem:[%s973_s3] sm:$0xff] %v685_v48 }

// kernel: model_forward.2
= control target key start
LH: loop header
LB: loop body
LE: loop exit
PB: predicated region body
PF: predicated region fallthrough
CT: control target
= control target key end

     0   :  { %10 = vsyncpa [#allocation3], 0  ;;  %s1722_s0 = inlined_call_operand.vmem [shape: s32[128,1], index: 0, kind: input, shape index: {}]   ;;  %s1723_s1 = inlined_call_operand.vmem [shape: f32[8,128], index: 1, kind: input, shape index: {}]   ;;  %s1724_s2 = inlined_call_operand.hbm [shape: f32[128,128], index: 2, kind: input, shape index: {}]   ;;  %s1725_s3 = inlined_call_operand.hbm [shape: f32[2,128,128], index: 3, kind: input, shape index: {}]   ;;  %s1726_s4 = inlined_call_operand.hbm [shape: f32[2,1,128], index: 4, kind: input, shape index: {}]   ;;  %s1727_s5 = inlined_call_operand.vmem [shape: f32[16,128], index: 5, kind: output, shape index: {}]  }
   0x1   :  { %11 = vsyncpa [#allocation5], 0  ;;  %s1405_s18 = smov [#allocation4]   ;;  %s1406_s20 = smov [#allocation2]  }
   0x2   :  { %s33_s19 = sshll.u32 %s1405_s18, 4  ;;  %s21_s21 = sshll.u32 %s1406_s20, 4  ;;  %s34_s19 = int_to_ptr.vmem [resolvable:$true] %s33_s19  ;;  %s1444_s21 = int_to_ptr.vmem [resolvable:$true] %s21_s21 }
   0x3   :  { %s1335_s24 = scalar_lea.hbm %s1725_s3, 4096 }
   0x4   :  { %p1336_p0 = scmp.ne.s32.totalorder %s1725_s3, %s1335_s24  ;;  %p1339_p1 = scmp.lt.u32.totalorder %s1335_s24, %s1725_s3 }
   0x6   :  { %p1341_p2 = pnand %p1339_p1, %p1336_p0 }
   0x8   :  { %1344 = shalt.err (!%p1341_p2)
}
   0x9   :  { %s1345_s29 = scalar_lea.vmem %s34_s19, 4096  ;;  %p1350_p4 = scmp.lt.s32.totalorder %s34_s19, %s34_s19 }
   0xa   :  { %p1346_p3 = scmp.ne.s32.totalorder %s34_s19, %s1345_s29  ;;  %p1351_p5 = scmp.lt.s32.totalorder %s1345_s29, %s1345_s29 }
   0xc   :  { %p1352_p6 = por %p1351_p5, %p1350_p4 }
   0xe   :  { %p1353_p7 = pnand %p1352_p6, %p1346_p3 }
  0x10   :  { %1356 = shalt.err (!%p1353_p7)
}
  0x11   :  { %s1407_s30 = smov 128   ;;  %s1408_s6 = smov 8  }
  0x12   :  { %39 = dma.hbm_to_vmem [thread:$0]  %s1725_s3, 4096, %s34_s19, [#allocation5], %s1407_s30, %s1407_s30, %s1408_s6  }
  0x13   :  { %s1357_s11 = scalar_lea.hbm %s1724_s2, 2048 }
  0x14   :  { %p1358_p8 = scmp.ne.s32.totalorder %s1724_s2, %s1357_s11  ;;  %p1361_p9 = scmp.lt.u32.totalorder %s1357_s11, %s1724_s2 }
  0x16   :  { %p1363_p10 = pnand %p1361_p9, %p1358_p8 }
  0x18   :  { %1366 = shalt.err (!%p1363_p10)
}
  0x19   :  { %s1367_s16 = scalar_lea.vmem %s1444_s21, 2048  ;;  %p1372_p12 = scmp.lt.s32.totalorder %s1444_s21, %s1444_s21 }
  0x1a   :  { %p1368_p11 = scmp.ne.s32.totalorder %s1444_s21, %s1367_s16  ;;  %p1373_p13 = scmp.lt.s32.totalorder %s1367_s16, %s1367_s16 }
  0x1c   :  { %p1374_p0 = por %p1373_p13, %p1372_p12 }
  0x1e   :  { %p1375_p1 = pnand %p1374_p0, %p1368_p11 }
  0x20   :  { %1378 = shalt.err (!%p1375_p1)
}
  0x21   :  { %27 = dma.hbm_to_vmem [thread:$0]  %s1724_s2, 2048, %s1444_s21, [#allocation3], %s1407_s30, %s1407_s30, %s1408_s6  }
  0x22   :  { %s1409_s18 = smov [#allocation6]   ;;  %s1379_s23 = scalar_lea.hbm %s1726_s4, 32 }
  0x23   :  { %s45_s19 = sshll.u32 %s1409_s18, 4  ;;  %p1380_p2 = scmp.ne.s32.totalorder %s1726_s4, %s1379_s23  ;;  %s46_s19 = int_to_ptr.vmem [resolvable:$true] %s45_s19 }
  0x24   :  { %p1383_p3 = scmp.lt.u32.totalorder %s1379_s23, %s1726_s4 }
  0x26   :  { %p1385_p4 = pnand %p1383_p3, %p1380_p2 }
  0x28   :  { %1388 = shalt.err (!%p1385_p4)
}
  0x29   :  { %s1389_s28 = scalar_lea.vmem %s46_s19, 32  ;;  %p1394_p6 = scmp.lt.s32.totalorder %s46_s19, %s46_s19 }
  0x2a   :  { %p1390_p5 = scmp.ne.s32.totalorder %s46_s19, %s1389_s28  ;;  %p1395_p7 = scmp.lt.s32.totalorder %s1389_s28, %s1389_s28 }
  0x2c   :  { %p1396_p8 = por %p1395_p7, %p1394_p6 }
  0x2e   :  { %p1397_p9 = pnand %p1396_p8, %p1390_p5 }
  0x30   :  { %1400 = shalt.err (!%p1397_p9)
}
  0x31   :  { %s1410_s2 = smov 16   ;;  %s1411_s21 = smov 1  }
  0x32   :  { %51 = dma.hbm_to_vmem [thread:$0]  %s1726_s4, 32, %s46_s19, [#allocation5], %s1410_s2, %s1410_s2, %s1411_s21  }
  0x33   :  { %1401 = dma.done.wait [#allocation3], 2048  }
  0x34   :  { %1402 = vsyncadd [#allocation3], 4294965248 }
  0x35   :  { %1403 = dma.done.wait [#allocation5], 4128  }
  0x36   :  { %1404 = vsyncadd [#allocation5], 4294963168  ;;  %v1412_v0 = vmov 0   ;;  %v63_v1 = vld [vmem:[%s1722_s0 + $0x10] sm:$0xff]  ;;  %v61_v2 = vld [vmem:[%s1722_s0] sm:$0xff]  ;;  %v77_v62 = vlaneseq }
  0x37   :  { %1334 = vset.pattern.permute.xlu1 %v1412_v0  ;;  %1333 = vset.pattern.permute.xlu0 %v1412_v0  ;;  %v64_v3 = vld [vmem:[%s1722_s0 + $0x18] sm:$0xff]  ;;  %v62_v4 = vld [vmem:[%s1722_s0 + $0x8] sm:$0xff]  ;;  %v175_v6 = vld [vmem:[#allocation2] sm:$0xff] }
  0x38   :  { %86 = vperm.xlu1 %1334, %v63_v1   ;;  %80 = vperm.xlu0 %1333, %v61_v2   ;;  %v66_v5 = vld [vmem:[%s1722_s0 + $0x28] sm:$0xff]  ;;  %v65_v8 = vld [vmem:[%s1722_s0 + $0x20] sm:$0xff]  ;;  %v177_v10 = vld [vmem:[#allocation2 + $0x10] sm:$0xff]  ;;  %v78_v63 = vand.u32 127, %v77_v62  ;;  %v1413_v2 = vmov 1.0  }
  0x39   :  { %v176_v7 = vld [vmem:[#allocation2 + $0x8] sm:$0xff]  ;;  %v178_v11 = vld [vmem:[#allocation2 + $0x18] sm:$0xff]  ;;  %v179_v13 = vld [vmem:[#allocation2 + $0x20] sm:$0xff] }
  0x3a   :  { %v1212_v9 = vpack.c.bf16 %v176_v7, %v175_v6  ;;  %v1216_v12 = vpack.c.bf16 %v178_v11, %v177_v10  ;;  %v180_v14 = vld [vmem:[#allocation2 + $0x28] sm:$0xff]  ;;  %v68_v15 = vld [vmem:[%s1722_s0 + $0x38] sm:$0xff]  ;;  %v67_v16 = vld [vmem:[%s1722_s0 + $0x30] sm:$0xff] }
  0x3b   :  { %v1220_v17 = vpack.c.bf16 %v180_v14, %v179_v13  ;;  %v181_v18 = vld [vmem:[#allocation2 + $0x30] sm:$0xff]  ;;  %v182_v19 = vld [vmem:[#allocation2 + $0x38] sm:$0xff]  ;;  %v70_v20 = vld [vmem:[%s1722_s0 + $0x48] sm:$0xff] }
  0x3c   :  { %89 = vperm.xlu1 %1334, %v64_v3   ;;  %83 = vperm.xlu0 %1333, %v62_v4   ;;  %v69_v21 = vld [vmem:[%s1722_s0 + $0x40] sm:$0xff]  ;;  %v1224_v22 = vpack.c.bf16 %v182_v19, %v181_v18  ;;  %v184_v24 = vld [vmem:[#allocation2 + $0x48] sm:$0xff]  ;;  %v72_v25 = vld [vmem:[%s1722_s0 + $0x58] sm:$0xff] }
  0x3d   :  { %1213 = vmatprep.subr.bf16.mxu0 %v1212_v9  ;;  %v183_v23 = vld [vmem:[#allocation2 + $0x40] sm:$0xff]  ;;  %v71_v26 = vld [vmem:[%s1722_s0 + $0x50] sm:$0xff]  ;;  %v186_v29 = vld [vmem:[#allocation2 + $0x58] sm:$0xff] }
  0x3e   :  { %1215 = vmatpush3.bf16.msra.mxu0 %v1212_v9  ;;  %v1228_v27 = vpack.c.bf16 %v184_v24, %v183_v23  ;;  %v185_v28 = vld [vmem:[#allocation2 + $0x50] sm:$0xff]  ;;  %v74_v30 = vld [vmem:[%s1722_s0 + $0x68] sm:$0xff]  ;;  %v73_v31 = vld [vmem:[%s1722_s0 + $0x60] sm:$0xff] }
  0x3f   :  { %1217 = vmatprep.subr.bf16.mxu0 %v1216_v12  ;;  %v1232_v32 = vpack.c.bf16 %v186_v29, %v185_v28  ;;  %v187_v33 = vld [vmem:[#allocation2 + $0x60] sm:$0xff]  ;;  %v188_v34 = vld [vmem:[#allocation2 + $0x68] sm:$0xff]  ;;  %v76_v35 = vld [vmem:[%s1722_s0 + $0x78] sm:$0xff] }
  0x40   :  { %95 = vperm.xlu1 %1334, %v66_v5   ;;  %92 = vperm.xlu0 %1333, %v65_v8   ;;  %v75_v36 = vld [vmem:[%s1722_s0 + $0x70] sm:$0xff]  ;;  %v1236_v37 = vpack.c.bf16 %v188_v34, %v187_v33  ;;  %v190_v39 = vld [vmem:[#allocation2 + $0x78] sm:$0xff]  ;;  %v353_v41 = vld [vmem:[#allocation4] sm:$0xff] }
  0x41   :  { %v189_v38 = vld [vmem:[#allocation2 + $0x70] sm:$0xff]  ;;  %v354_v42 = vld [vmem:[#allocation4 + $0x8] sm:$0xff]  ;;  %v356_v45 = vld [vmem:[#allocation4 + $0x18] sm:$0xff] }
  0x42   :  { %1219 = vmatpush3.bf16.msra.mxu0 %v1216_v12  ;;  %v1240_v40 = vpack.c.bf16 %v190_v39, %v189_v38  ;;  %v355_v43 = vld [vmem:[#allocation4 + $0x10] sm:$0xff]  ;;  %v1244_v44 = vpack.c.bf16 %v354_v42, %v353_v41  ;;  %v357_v47 = vld [vmem:[#allocation4 + $0x20] sm:$0xff]  ;;  %v358_v48 = vld [vmem:[#allocation4 + $0x28] sm:$0xff] }
  0x43   :  { %1221 = vmatprep.subr.bf16.mxu0 %v1220_v17  ;;  %v1248_v46 = vpack.c.bf16 %v356_v45, %v355_v43  ;;  %v1252_v49 = vpack.c.bf16 %v358_v48, %v357_v47  ;;  %v359_v50 = vld [vmem:[#allocation4 + $0x30] sm:$0xff]  ;;  %v360_v51 = vld [vmem:[#allocation4 + $0x38] sm:$0xff]  ;;  %v361_v53 = vld [vmem:[#allocation4 + $0x40] sm:$0xff] }
  0x44   :  { %101 = vperm.xlu1 %1334, %v68_v15   ;;  %98 = vperm.xlu0 %1333, %v67_v16   ;;  %v1256_v52 = vpack.c.bf16 %v360_v51, %v359_v50  ;;  %v362_v54 = vld [vmem:[#allocation4 + $0x48] sm:$0xff]  ;;  %v363_v56 = vld [vmem:[#allocation4 + $0x50] sm:$0xff]  ;;  %v364_v57 = vld [vmem:[#allocation4 + $0x58] sm:$0xff] }
  0x45   :  { %1245 = vmatprep.subr.bf16.mxu1 %v1244_v44  ;;  %v1260_v55 = vpack.c.bf16 %v362_v54, %v361_v53  ;;  %v1264_v58 = vpack.c.bf16 %v364_v57, %v363_v56  ;;  %v365_v59 = vld [vmem:[#allocation4 + $0x60] sm:$0xff]  ;;  %v366_v60 = vld [vmem:[#allocation4 + $0x68] sm:$0xff]  ;;  %v368_v18 = vld [vmem:[#allocation4 + $0x78] sm:$0xff] }
  0x46   :  { %1223 = vmatpush3.bf16.msra.mxu0 %v1220_v17  ;;  %1247 = vmatpush3.bf16.msra.mxu1 %v1244_v44  ;;  %v1268_v61 = vpack.c.bf16 %v366_v60, %v365_v59  ;;  %v367_v17 = vld [vmem:[#allocation4 + $0x70] sm:$0xff]  ;;  %v557_v24 = vld [vmem:[#allocation4 + $0x98] sm:$0xff]  ;;  %v563_v33 = vld [vmem:[#allocation4 + $0xc8] sm:$0xff] }
  0x47   :  { %1225 = vmatprep.subr.bf16.mxu0 %v1224_v22  ;;  %1249 = vmatprep.subr.bf16.mxu1 %v1248_v46  ;;  %v1272_v19 = vpack.c.bf16 %v368_v18, %v367_v17  ;;  %v560_v29 = vld [vmem:[#allocation4 + $0xb0] sm:$0xff]  ;;  %v336_v38 = vld [vmem:[%s1723_s1] sm:$0xff] }
  0x48   :  { %107 = vperm.xlu1 %1334, %v70_v20   ;;  %104 = vperm.xlu0 %1333, %v69_v21   ;;  %v554_v20 = vld [vmem:[#allocation4 + $0x80] sm:$0xff]  ;;  %v555_v21 = vld [vmem:[#allocation4 + $0x88] sm:$0xff] }
  0x49   :  { %v1276_v23 = vpack.c.bf16 %v555_v21, %v554_v20 }
  0x4a   :  { %1227 = vmatpush3.bf16.msra.mxu0 %v1224_v22  ;;  %1251 = vmatpush3.bf16.msra.mxu1 %v1248_v46  ;;  %v556_v22 = vld [vmem:[#allocation4 + $0x90] sm:$0xff] }
  0x4b   :  { %1229 = vmatprep.subr.bf16.mxu0 %v1228_v27  ;;  %1253 = vmatprep.subr.bf16.mxu1 %v1252_v49 }
  0x4c   :  { %113 = vperm.xlu1 %1334, %v72_v25   ;;  %110 = vperm.xlu0 %1333, %v71_v26   ;;  %v1280_v25 = vpack.c.bf16 %v557_v24, %v556_v22  ;;  %v558_v26 = vld [vmem:[#allocation4 + $0xa0] sm:$0xff] }
  0x4e   :  { %1231 = vmatpush3.bf16.msra.mxu0 %v1228_v27  ;;  %1255 = vmatpush3.bf16.msra.mxu1 %v1252_v49  ;;  %v559_v27 = vld [vmem:[#allocation4 + $0xa8] sm:$0xff] }
  0x4f   :  { %1233 = vmatprep.subr.bf16.mxu0 %v1232_v32  ;;  %1257 = vmatprep.subr.bf16.mxu1 %v1256_v52  ;;  %v1284_v28 = vpack.c.bf16 %v559_v27, %v558_v26 }
  0x50   :  { %119 = vperm.xlu1 %1334, %v74_v30   ;;  %116 = vperm.xlu0 %1333, %v73_v31   ;;  %v561_v30 = vld [vmem:[#allocation4 + $0xb8] sm:$0xff] }
  0x51   :  { %v1288_v31 = vpack.c.bf16 %v561_v30, %v560_v29 }
  0x52   :  { %1235 = vmatpush3.bf16.msra.mxu0 %v1232_v32  ;;  %1259 = vmatpush3.bf16.msra.mxu1 %v1256_v52  ;;  %v562_v32 = vld [vmem:[#allocation4 + $0xc0] sm:$0xff] }
  0x53   :  { %1237 = vmatprep.subr.bf16.mxu0 %v1236_v37  ;;  %1261 = vmatprep.subr.bf16.mxu1 %v1260_v55  ;;  %v1292_v34 = vpack.c.bf16 %v563_v33, %v562_v32 }
  0x54   :  { %125 = vperm.xlu1 %1334, %v76_v35   ;;  %122 = vperm.xlu0 %1333, %v75_v36   ;;  %v564_v35 = vld [vmem:[#allocation4 + $0xd0] sm:$0xff]  ;;  %v565_v36 = vld [vmem:[#allocation4 + $0xd8] sm:$0xff] }
  0x56   :  { %1239 = vmatpush3.bf16.msra.mxu0 %v1236_v37  ;;  %1263 = vmatpush3.bf16.msra.mxu1 %v1260_v55  ;;  %v1296_v37 = vpack.c.bf16 %v565_v36, %v564_v35 }
  0x57   :  { %1241 = vmatprep.subr.bf16.mxu0 %v1240_v40  ;;  %1265 = vmatprep.subr.bf16.mxu1 %v1264_v58 }
  0x5a   :  { %1243 = vmatpush3.bf16.msra.mxu0 %v1240_v40  ;;  %1267 = vmatpush3.bf16.msra.mxu1 %v1264_v58 }
  0x5b   :  { %1269 = vmatprep.subr.bf16.mxu1 %v1268_v61  ;;  %1277 = vmatprep.subr.bf16.mxu0 %v1276_v23 }
  0x5e   :  { %1271 = vmatpush3.bf16.msra.mxu1 %v1268_v61 }
  0x5f   :  { %1273 = vmatprep.subr.bf16.mxu1 %v1272_v19 }
  0x62   :  { %1275 = vmatpush3.bf16.msra.mxu1 %v1272_v19 }
  0x63   :  { %1308 = vmatprep.subr.bf16.mxu1 %v1276_v23 }
  0xb7   :  { %v87_v0 = vpop.permute.xlu1 %86  ;;  %v81_v1 = vpop.permute.xlu0 %80 }
  0xb8   :  { %vm127_vm0 = vcmp.eq.s32.totalorder %v78_v63, %v81_v1  ;;  %vm129_vm1 = vcmp.eq.s32.totalorder %v78_v63, %v87_v0 }
  0xb9   :  { %1076 = vmatprep.mubr.msk.f32.mxu0 %vm127_vm0, %v1413_v2  ;;  %vm883_vm0 = vcmask 1041409  }
  0xbb   :  { %v90_v3 = vpop.permute.xlu1 %89  ;;  %v84_v4 = vpop.permute.xlu0 %83 }
  0xbc   :  { %vm128_vm2 = vcmp.eq.s32.totalorder %v78_v63, %v84_v4  ;;  %vm130_vm3 = vcmp.eq.s32.totalorder %v78_v63, %v90_v3 }
  0xbd   :  { %1077 = vmatmul.mubr.msk.f32.vlgmr.msra.gmra.mrb[0].mxu0 %vm128_vm2, %v1413_v2  ;;  %vm887_vm2 = vcmask 1043459  }
  0xbe   :  { %1079 = vmatprep.mubr.msk.f32.mxu0 %vm129_vm1, %v1413_v2  ;;  %1279 = vmatpush3.bf16.msra.mxu0 %v1276_v23  ;;  %vm885_vm1 = vcmask 1042434  }
  0xbf   :  { %v96_v5 = vpop.permute.xlu1 %95  ;;  %v93_v6 = vpop.permute.xlu0 %92  ;;  %1281 = vmatprep.subr.bf16.mxu0 %v1280_v25 }
  0xc0   :  { %vm131_vm4 = vcmp.eq.s32.totalorder %v78_v63, %v93_v6  ;;  %vm132_vm5 = vcmp.eq.s32.totalorder %v78_v63, %v96_v5 }
  0xc1   :  { %1080 = vmatmul.mubr.msk.f32.gmra.mrb[2].mxu0 %vm130_vm3, %v1413_v2  ;;  %vm889_vm3 = vcmask 1044484  }
  0xc2   :  { %1082 = vmatprep.mubr.msk.f32.mxu0 %vm131_vm4, %v1413_v2  ;;  %1283 = vmatpush3.bf16.msra.mxu0 %v1280_v25  ;;  %vm891_vm4 = vcmask 1045509  }
  0xc3   :  { %v102_v7 = vpop.permute.xlu1 %101  ;;  %v99_v8 = vpop.permute.xlu0 %98  ;;  %1285 = vmatprep.subr.bf16.mxu0 %v1284_v28 }
  0xc4   :  { %vm133_vm6 = vcmp.eq.s32.totalorder %v78_v63, %v99_v8  ;;  %vm134_vm7 = vcmp.eq.s32.totalorder %v78_v63, %v102_v7  ;;  %v566_v7 = vld [vmem:[#allocation4 + $0xe0] sm:$0xff]  ;;  %v567_v8 = vld [vmem:[#allocation4 + $0xe8] sm:$0xff] }
  0xc5   :  { %1083 = vmatmul.mubr.msk.f32.gmra.mrb[4].mxu0 %vm132_vm5, %v1413_v2  ;;  %vm893_vm5 = vcmask 1046534  }
  0xc6   :  { %1085 = vmatprep.mubr.msk.f32.mxu0 %vm133_vm6, %v1413_v2  ;;  %1287 = vmatpush3.bf16.msra.mxu0 %v1284_v28  ;;  %vm895_vm6 = vcmask 1047559  }
  0xc7   :  { %v108_v9 = vpop.permute.xlu1 %107  ;;  %v105_v10 = vpop.permute.xlu0 %104  ;;  %1289 = vmatprep.subr.bf16.mxu0 %v1288_v31 }
  0xc8   :  { %vm135_vm8 = vcmp.eq.s32.totalorder %v78_v63, %v105_v10  ;;  %vm136_vm9 = vcmp.eq.s32.totalorder %v78_v63, %v108_v9  ;;  %v1300_v9 = vpack.c.bf16 %v567_v8, %v566_v7  ;;  %v568_v10 = vld [vmem:[#allocation4 + $0xf0] sm:$0xff] }
  0xc9   :  { %1086 = vmatmul.mubr.msk.f32.gmra.mrb[6].mxu0 %vm134_vm7, %v1413_v2 }
  0xca   :  { %1088 = vmatprep.mubr.msk.f32.mxu0 %vm135_vm8, %v1413_v2  ;;  %1291 = vmatpush3.bf16.msra.mxu0 %v1288_v31 }
  0xcb   :  { %v114_v11 = vpop.permute.xlu1 %113  ;;  %v111_v12 = vpop.permute.xlu0 %110  ;;  %1293 = vmatprep.subr.bf16.mxu0 %v1292_v34 }
  0xcc   :  { %vm137_vm10 = vcmp.eq.s32.totalorder %v78_v63, %v111_v12  ;;  %vm138_vm11 = vcmp.eq.s32.totalorder %v78_v63, %v114_v11  ;;  %v569_v11 = vld [vmem:[#allocation4 + $0xf8] sm:$0xff] }
  0xcd   :  { %1089 = vmatmul.mubr.msk.f32.gmra.mrb[8].mxu0 %vm136_vm9, %v1413_v2  ;;  %v1304_v12 = vpack.c.bf16 %v569_v11, %v568_v10 }
  0xce   :  { %1091 = vmatprep.mubr.msk.f32.mxu0 %vm137_vm10, %v1413_v2  ;;  %1295 = vmatpush3.bf16.msra.mxu0 %v1292_v34 }
  0xcf   :  { %v120_v13 = vpop.permute.xlu1 %119  ;;  %v117_v14 = vpop.permute.xlu0 %116  ;;  %1297 = vmatprep.subr.bf16.mxu0 %v1296_v37 }
  0xd0   :  { %vm139_vm12 = vcmp.eq.s32.totalorder %v78_v63, %v117_v14  ;;  %vm140_vm13 = vcmp.eq.s32.totalorder %v78_v63, %v120_v13  ;;  %v1586_v13 = vld [vmem:[#allocation6] ss:$0 sm:$0xff] }
  0xd1   :  { %1092 = vmatmul.mubr.msk.f32.gmra.mrb[10].mxu0 %vm138_vm11, %v1413_v2 }
  0xd2   :  { %1094 = vmatprep.mubr.msk.f32.mxu0 %vm139_vm12, %v1413_v2  ;;  %1299 = vmatpush3.bf16.msra.mxu0 %v1296_v37 }
  0xd3   :  { %v123_v15 = vpop.permute.xlu0 %122  ;;  %v126_v16 = vpop.permute.xlu1 %125  ;;  %1301 = vmatprep.subr.bf16.mxu0 %v1300_v9 }
  0xd4   :  { %vm141_vm14 = vcmp.eq.s32.totalorder %v78_v63, %v123_v15  ;;  %vm142_vm15 = vcmp.eq.s32.totalorder %v78_v63, %v126_v16 }
  0xd5   :  { %1095 = vmatmul.mubr.msk.f32.gmra.mrb[12].mxu0 %vm140_vm13, %v1413_v2 }
  0xd6   :  { %1097 = vmatprep.mubr.msk.f32.mxu0 %vm141_vm14, %v1413_v2  ;;  %1303 = vmatpush3.bf16.msra.mxu0 %v1300_v9 }
  0xd7   :  { %1305 = vmatprep.subr.bf16.mxu0 %v1304_v12 }
  0xd9   :  { %1098 = vmatmul.mubr.msk.f32.gmra.mrb[14].mxu0 %vm142_vm15, %v1413_v2 }
  0xda   :  { %1307 = vmatpush3.bf16.msra.mxu0 %v1304_v12 }
 0x190   :  { %v1078_v39 = vpop.f32.mrb[0].mxu0 }
 0x191   :  { %v257_v40 = vpop.f32.mrb[1].mxu0  ;;  %v1540_v42 = vadd.f32 %v1078_v39, %v336_v38 }
 0x192   :  { %v1538_v41 = vadd.f32 %v336_v38, %v257_v40 }
 0x194   :  { %v1081_v43 = vpop.f32.mrb[2].mxu0  ;;  %1132 = vmatprep.mubr.f32.mxu1 %v1538_v41 }
 0x195   :  { %v267_v44 = vpop.f32.mrb[3].mxu0  ;;  %1133 = vmatmul.mubr.f32.vlgmr.msra.gmra.mrb[0].mxu1 %v1540_v42  ;;  %v1546_v46 = vadd.f32 %v1081_v43, %v336_v38 }
 0x196   :  { %v1544_v45 = vadd.f32 %v336_v38, %v267_v44  ;;  %1316 = vmatpush3.bf16.msra.mxu1 %v1276_v23 }
 0x197   :  { %1309 = vmatprep.subr.bf16.mxu1 %v1280_v25 }
 0x198   :  { %v1084_v47 = vpop.f32.mrb[4].mxu0  ;;  %1135 = vmatprep.mubr.f32.mxu1 %v1544_v45 }
 0x199   :  { %v277_v48 = vpop.f32.mrb[5].mxu0  ;;  %1136 = vmatmul.mubr.f32.gmra.mrb[2].mxu1 %v1546_v46  ;;  %v1552_v50 = vadd.f32 %v1084_v47, %v336_v38 }
 0x19a   :  { %v1550_v49 = vadd.f32 %v336_v38, %v277_v48  ;;  %1317 = vmatpush3.bf16.msra.mxu1 %v1280_v25 }
 0x19b   :  { %1310 = vmatprep.subr.bf16.mxu1 %v1284_v28 }
 0x19c   :  { %v1087_v51 = vpop.f32.mrb[6].mxu0  ;;  %1138 = vmatprep.mubr.f32.mxu1 %v1550_v49 }
 0x19d   :  { %v287_v52 = vpop.f32.mrb[7].mxu0  ;;  %1139 = vmatmul.mubr.f32.gmra.mrb[4].mxu1 %v1552_v50  ;;  %v1558_v54 = vadd.f32 %v1087_v51, %v336_v38 }
 0x19e   :  { %v1556_v53 = vadd.f32 %v336_v38, %v287_v52  ;;  %1318 = vmatpush3.bf16.msra.mxu1 %v1284_v28 }
 0x19f   :  { %1311 = vmatprep.subr.bf16.mxu1 %v1288_v31 }
 0x1a0   :  { %v1090_v55 = vpop.f32.mrb[8].mxu0  ;;  %1141 = vmatprep.mubr.f32.mxu1 %v1556_v53 }
 0x1a1   :  { %v297_v56 = vpop.f32.mrb[9].mxu0  ;;  %1142 = vmatmul.mubr.f32.gmra.mrb[6].mxu1 %v1558_v54  ;;  %v1564_v58 = vadd.f32 %v1090_v55, %v336_v38 }
 0x1a2   :  { %v1562_v57 = vadd.f32 %v336_v38, %v297_v56  ;;  %1319 = vmatpush3.bf16.msra.mxu1 %v1288_v31 }
 0x1a3   :  { %1312 = vmatprep.subr.bf16.mxu1 %v1292_v34 }
 0x1a4   :  { %v1093_v59 = vpop.f32.mrb[10].mxu0  ;;  %1144 = vmatprep.mubr.f32.mxu1 %v1562_v57 }
 0x1a5   :  { %v307_v60 = vpop.f32.mrb[11].mxu0  ;;  %1145 = vmatmul.mubr.f32.gmra.mrb[8].mxu1 %v1564_v58  ;;  %v1570_v62 = vadd.f32 %v1093_v59, %v336_v38 }
 0x1a6   :  { %v1568_v61 = vadd.f32 %v336_v38, %v307_v60  ;;  %1320 = vmatpush3.bf16.msra.mxu1 %v1292_v34 }
 0x1a7   :  { %1313 = vmatprep.subr.bf16.mxu1 %v1296_v37 }
 0x1a8   :  { %v1096_v63 = vpop.f32.mrb[12].mxu0  ;;  %1147 = vmatprep.mubr.f32.mxu1 %v1568_v61 }
 0x1a9   :  { %v317_v0 = vpop.f32.mrb[13].mxu0  ;;  %1148 = vmatmul.mubr.f32.gmra.mrb[10].mxu1 %v1570_v62  ;;  %v1576_v2 = vadd.f32 %v1096_v63, %v336_v38 }
 0x1aa   :  { %v1574_v1 = vadd.f32 %v336_v38, %v317_v0  ;;  %1321 = vmatpush3.bf16.msra.mxu1 %v1296_v37 }
 0x1ab   :  { %1314 = vmatprep.subr.bf16.mxu1 %v1300_v9 }
 0x1ac   :  { %v1099_v3 = vpop.f32.mrb[14].mxu0  ;;  %1150 = vmatprep.mubr.f32.mxu1 %v1574_v1 }
 0x1ad   :  { %v327_v4 = vpop.f32.mrb[15].mxu0  ;;  %1151 = vmatmul.mubr.f32.gmra.mrb[12].mxu1 %v1576_v2  ;;  %v1582_v6 = vadd.f32 %v1099_v3, %v336_v38 }
 0x1ae   :  { %v1580_v5 = vadd.f32 %v336_v38, %v327_v4  ;;  %1322 = vmatpush3.bf16.msra.mxu1 %v1300_v9 }
 0x1af   :  { %1315 = vmatprep.subr.bf16.mxu1 %v1304_v12 }
 0x1b0   :  { %1153 = vmatprep.mubr.f32.mxu1 %v1580_v5 }
 0x1b1   :  { %1154 = vmatmul.mubr.f32.gmra.mrb[14].mxu1 %v1582_v6 }
 0x1b2   :  { %1323 = vmatpush3.bf16.msra.mxu1 %v1304_v12 }
 0x268   :  { %v1134_v14 = vpop.f32.mrb[0].mxu1 }
 0x269   :  { %v448_v15 = vadd.f32 %v1134_v14, %v1586_v13  ;;  %v442_v16 = vpop.f32.mrb[1].mxu1 }
 0x26a   :  { %v443_v17 = vadd.f32 %v1586_v13, %v442_v16 }
 0x26b   :  { %v522_v18 = vmax.f32 %v448_v15, 0.0 }
 0x26c   :  { %v521_v19 = vmax.f32 %v443_v17, 0.0  ;;  %v1137_v20 = vpop.f32.mrb[2].mxu1 }
 0x26d   :  { %v458_v21 = vadd.f32 %v1137_v20, %v1586_v13  ;;  %v452_v22 = vpop.f32.mrb[3].mxu1  ;;  %v1596_v25 = vadd.f32 %v522_v18, %v1540_v42 }
 0x26e   :  { %v1592_v23 = vadd.f32 %v521_v19, %v1538_v41  ;;  %v453_v24 = vadd.f32 %v1586_v13, %v452_v22 }
 0x26f   :  { %v524_v26 = vmax.f32 %v458_v21, 0.0 }
 0x270   :  { %v523_v27 = vmax.f32 %v453_v24, 0.0  ;;  %v1140_v28 = vpop.f32.mrb[4].mxu1  ;;  %1188 = vmatprep.mubr.f32.mxu0 %v1592_v23 }
 0x271   :  { %v468_v29 = vadd.f32 %v1140_v28, %v1586_v13  ;;  %v462_v30 = vpop.f32.mrb[5].mxu1  ;;  %1189 = vmatmul.mubr.f32.vlgmr.msra.gmra.mrb[16].mxu0 %v1596_v25  ;;  %v1606_v33 = vadd.f32 %v524_v26, %v1546_v46 }
 0x272   :  { %v1602_v31 = vadd.f32 %v523_v27, %v1544_v45  ;;  %v463_v32 = vadd.f32 %v1586_v13, %v462_v30 }
 0x273   :  { %v526_v34 = vmax.f32 %v468_v29, 0.0 }
 0x274   :  { %v525_v35 = vmax.f32 %v463_v32, 0.0  ;;  %v1143_v36 = vpop.f32.mrb[6].mxu1  ;;  %1191 = vmatprep.mubr.f32.mxu0 %v1602_v31 }
 0x275   :  { %v478_v37 = vadd.f32 %v1143_v36, %v1586_v13  ;;  %v472_v38 = vpop.f32.mrb[7].mxu1  ;;  %1192 = vmatmul.mubr.f32.gmra.mrb[18].mxu0 %v1606_v33  ;;  %v1616_v41 = vadd.f32 %v526_v34, %v1552_v50 }
 0x276   :  { %v1612_v39 = vadd.f32 %v525_v35, %v1550_v49  ;;  %v473_v40 = vadd.f32 %v1586_v13, %v472_v38 }
 0x277   :  { %v528_v42 = vmax.f32 %v478_v37, 0.0 }
 0x278   :  { %v527_v43 = vmax.f32 %v473_v40, 0.0  ;;  %v1146_v44 = vpop.f32.mrb[8].mxu1  ;;  %1194 = vmatprep.mubr.f32.mxu0 %v1612_v39 }
 0x279   :  { %v488_v45 = vadd.f32 %v1146_v44, %v1586_v13  ;;  %v482_v46 = vpop.f32.mrb[9].mxu1  ;;  %1195 = vmatmul.mubr.f32.gmra.mrb[20].mxu0 %v1616_v41  ;;  %v1626_v49 = vadd.f32 %v528_v42, %v1558_v54 }
 0x27a   :  { %v1622_v47 = vadd.f32 %v527_v43, %v1556_v53  ;;  %v483_v48 = vadd.f32 %v1586_v13, %v482_v46 }
 0x27b   :  { %v530_v50 = vmax.f32 %v488_v45, 0.0 }
 0x27c   :  { %v529_v51 = vmax.f32 %v483_v48, 0.0  ;;  %v1149_v52 = vpop.f32.mrb[10].mxu1  ;;  %1197 = vmatprep.mubr.f32.mxu0 %v1622_v47 }
 0x27d   :  { %v498_v55 = vadd.f32 %v1149_v52, %v1586_v13  ;;  %v492_v56 = vpop.f32.mrb[11].mxu1  ;;  %1198 = vmatmul.mubr.f32.gmra.mrb[22].mxu0 %v1626_v49  ;;  %v1636_v60 = vadd.f32 %v530_v50, %v1564_v58 }
 0x27e   :  { %v1632_v59 = vadd.f32 %v529_v51, %v1562_v57  ;;  %v493_v53 = vadd.f32 %v1586_v13, %v492_v56 }
 0x27f   :  { %v532_v54 = vmax.f32 %v498_v55, 0.0 }
 0x280   :  { %v531_v63 = vmax.f32 %v493_v53, 0.0  ;;  %v1152_v0 = vpop.f32.mrb[12].mxu1  ;;  %1200 = vmatprep.mubr.f32.mxu1 %v1632_v59 }
 0x281   :  { %v508_v3 = vadd.f32 %v1152_v0, %v1586_v13  ;;  %v502_v4 = vpop.f32.mrb[13].mxu1  ;;  %1201 = vmatmul.mubr.f32.vlgmr.msra.gmra.mrb[16].mxu1 %v1636_v60  ;;  %v1646_v8 = vadd.f32 %v532_v54, %v1570_v62 }
 0x282   :  { %v1642_v7 = vadd.f32 %v531_v63, %v1568_v61  ;;  %v503_v57 = vadd.f32 %v1586_v13, %v502_v4 }
 0x283   :  { %v534_v58 = vmax.f32 %v508_v3, 0.0 }
 0x284   :  { %v533_v9 = vmax.f32 %v503_v57, 0.0  ;;  %v1155_v10 = vpop.f32.mrb[14].mxu1  ;;  %1203 = vmatprep.mubr.f32.mxu1 %v1642_v7 }
 0x285   :  { %v518_v11 = vadd.f32 %v1155_v10, %v1586_v13  ;;  %v512_v12 = vpop.f32.mrb[15].mxu1  ;;  %1204 = vmatmul.mubr.f32.gmra.mrb[18].mxu1 %v1646_v8  ;;  %v1656_v15 = vadd.f32 %v534_v58, %v1576_v2 }
 0x286   :  { %v1652_v14 = vadd.f32 %v533_v9, %v1574_v1  ;;  %v513_v61 = vadd.f32 %v1586_v13, %v512_v12  ;;  %v1668_v1 = vld [vmem:[#allocation6 + $0x1] ss:$0 sm:$0xff] }
 0x287   :  { %v536_v62 = vmax.f32 %v518_v11, 0.0 }
 0x288   :  { %v535_v16 = vmax.f32 %v513_v61, 0.0  ;;  %1206 = vmatprep.mubr.f32.mxu1 %v1652_v14 }
 0x289   :  { %1207 = vmatmul.mubr.f32.gmra.mrb[20].mxu1 %v1656_v15  ;;  %v1664_v18 = vadd.f32 %v536_v62, %v1582_v6 }
 0x28a   :  { %v1661_v17 = vadd.f32 %v535_v16, %v1580_v5 }
 0x28c   :  { %1209 = vmatprep.mubr.f32.mxu1 %v1661_v17 }
 0x28d   :  { %1210 = vmatmul.mubr.f32.gmra.mrb[22].mxu1 %v1664_v18 }
 0x344   :  { %v1190_v2 = vpop.f32.mrb[16].mxu0 }
 0x345   :  { %v650_v13 = vadd.f32 %v1190_v2, %v1668_v1  ;;  %v644_v19 = vpop.f32.mrb[17].mxu0 }
 0x346   :  { %v645_v20 = vadd.f32 %v1668_v1, %v644_v19 }
 0x347   :  { %v724_v21 = vmax.f32 %v650_v13, 0.0 }
 0x348   :  { %v723_v22 = vmax.f32 %v645_v20, 0.0  ;;  %v1193_v24 = vpop.f32.mrb[18].mxu0 }
 0x349   :  { %v740_v5 = vadd.f32 %v724_v21, %v1596_v25  ;;  %v660_v6 = vadd.f32 %v1193_v24, %v1668_v1  ;;  %v654_v26 = vpop.f32.mrb[19].mxu0 }
 0x34a   :  { %v739_v27 = vadd.f32 %v723_v22, %v1592_v23  ;;  %v655_v28 = vadd.f32 %v1668_v1, %v654_v26 }
 0x34b   :  { %v761_v29 = vrot.slane %v740_v5, 4  ;;  %v726_v30 = vmax.f32 %v660_v6, 0.0 }
 0x34c   :  { %v755_v32 = vrot.slane %v739_v27, 4  ;;  %v725_v34 = vmax.f32 %v655_v28, 0.0  ;;  %v1196_v35 = vpop.f32.mrb[20].mxu0 }
 0x34d   :  { %v762_v36 = vadd.f32 %v761_v29, %v740_v5  ;;  %v742_v37 = vadd.f32 %v726_v30, %v1606_v33  ;;  %v670_v38 = vadd.f32 %v1196_v35, %v1668_v1  ;;  %v664_v40 = vpop.f32.mrb[21].mxu0 }
 0x34e   :  { %v756_v42 = vadd.f32 %v755_v32, %v739_v27  ;;  %v741_v25 = vadd.f32 %v725_v34, %v1602_v31  ;;  %v665_v43 = vadd.f32 %v1668_v1, %v664_v40 }
 0x34f   :  { %v763_v44 = vrot.slane %v762_v36, 2  ;;  %v773_v23 = vrot.slane %v742_v37, 4  ;;  %v728_v45 = vmax.f32 %v670_v38, 0.0 }
 0x350   :  { %v757_v46 = vrot.slane %v756_v42, 2  ;;  %v767_v48 = vrot.slane %v741_v25, 4  ;;  %v727_v50 = vmax.f32 %v665_v43, 0.0  ;;  %v1199_v51 = vpop.f32.mrb[22].mxu0 }
 0x351   :  { %v764_v52 = vadd.f32 %v763_v44, %v762_v36  ;;  %v774_v55 = vadd.f32 %v773_v23, %v742_v37  ;;  %v744_v33 = vadd.f32 %v728_v45, %v1616_v41  ;;  %v680_v56 = vadd.f32 %v1199_v51, %v1668_v1  ;;  %v674_v53 = vpop.f32.mrb[23].mxu0 }
 0x352   :  { %v758_v54 = vadd.f32 %v757_v46, %v756_v42  ;;  %v768_v63 = vadd.f32 %v767_v48, %v741_v25  ;;  %v743_v31 = vadd.f32 %v727_v50, %v1612_v39  ;;  %v675_v0 = vadd.f32 %v1668_v1, %v674_v53 }
 0x353   :  { %v765_v3 = vrot.slane %v764_v52, 1  ;;  %v775_v4 = vrot.slane %v774_v55, 2  ;;  %v785_v57 = vrot.slane %v744_v33, 4  ;;  %v730_v58 = vmax.f32 %v680_v56, 0.0 }
 0x354   :  { %v759_v9 = vrot.slane %v758_v54, 1  ;;  %v769_v10 = vrot.slane %v768_v63, 2  ;;  %v779_v11 = vrot.slane %v743_v31, 4  ;;  %v729_v12 = vmax.f32 %v675_v0, 0.0  ;;  %v1202_v41 = vpop.f32.mrb[16].mxu1 }
 0x355   :  { %v766_v61 = vadd.f32 %v765_v3, %v764_v52  ;;  %v776_v62 = vadd.f32 %v775_v4, %v774_v55  ;;  %v786_v16 = vadd.f32 %v785_v57, %v744_v33  ;;  %v746_v2 = vadd.f32 %v730_v58, %v1626_v49  ;;  %v684_v13 = vpop.f32.mrb[17].mxu1 }
 0x356   :  { %v760_v39 = vadd.f32 %v759_v9, %v758_v54  ;;  %v770_v19 = vadd.f32 %v769_v10, %v768_v63  ;;  %v780_v20 = vadd.f32 %v779_v11, %v743_v31  ;;  %v745_v21 = vadd.f32 %v729_v12, %v1622_v47 }
 0x357   :  { %v852_v22 = vmul.f32 0.125, %v766_v61  ;;  %v777_v24 = vrot.slane %v776_v62, 1  ;;  %v787_v5 = vrot.slane %v786_v16, 2  ;;  %v797_v6 = vrot.slane %v746_v2, 4 }
 0x358   :  { %v851_v26 = vmul.f32 0.125, %v760_v39  ;;  %v771_v27 = vrot.slane %v770_v19, 1  ;;  %v781_v28 = vrot.slane %v780_v20, 2  ;;  %v791_v29 = vrot.slane %v745_v21, 4  ;;  %v1205_v30 = vpop.f32.mrb[18].mxu1 }
 0x359   :  { %v778_v32 = vadd.f32 %v777_v24, %v776_v62  ;;  %v788_v34 = vadd.f32 %v787_v5, %v786_v16  ;;  %v798_v49 = vadd.f32 %v797_v6, %v746_v2  ;;  %v690_v35 = vadd.f32 %v1202_v41, %v1668_v1  ;;  %v694_v36 = vpop.f32.mrb[19].mxu1 }
 0x35a   :  { %v884_v37 = vsel %vm883_vm0, %v852_v22, %v851_v26  ;;  %v772_v47 = vadd.f32 %v771_v27, %v770_v19  ;;  %v782_v38 = vadd.f32 %v781_v28, %v780_v20  ;;  %v792_v40 = vadd.f32 %v791_v29, %v745_v21 }
 0x35b   :  { %v854_v42 = vmul.f32 0.125, %v778_v32  ;;  %v789_v25 = vrot.slane %v788_v34, 1  ;;  %v799_v43 = vrot.slane %v798_v49, 2  ;;  %v732_v44 = vmax.f32 %v690_v35, 0.0 }
 0x35c   :  { %v853_v23 = vmul.f32 0.125, %v772_v47  ;;  %v783_v45 = vrot.slane %v782_v38, 1  ;;  %v793_v46 = vrot.slane %v792_v40, 2  ;;  %v685_v48 = vadd.f32 %v1668_v1, %v684_v13  ;;  %v1208_v50 = vpop.f32.mrb[20].mxu1 }
 0x35d   :  { %v790_v51 = vadd.f32 %v789_v25, %v788_v34  ;;  %v800_v52 = vadd.f32 %v799_v43, %v798_v49  ;;  %v748_v55 = vadd.f32 %v732_v44, %v1636_v60  ;;  %v700_v33 = vadd.f32 %v1205_v30, %v1668_v1  ;;  %v704_v56 = vpop.f32.mrb[21].mxu1 }
 0x35e   :  { %v886_v53 = vsel %vm885_vm1, %v853_v23, %v884_v37  ;;  %v784_v54 = vadd.f32 %v783_v45, %v782_v38  ;;  %v794_v63 = vadd.f32 %v793_v46, %v792_v40  ;;  %v731_v31 = vmax.f32 %v685_v48, 0.0 }
 0x35f   :  { %v856_v0 = vmul.f32 0.125, %v790_v51  ;;  %v888_v3 = vsel %vm887_vm2, %v854_v42, %v886_v53  ;;  %v801_v4 = vrot.slane %v800_v52, 1  ;;  %v809_v57 = vrot.slane %v748_v55, 4 }
 0x360   :  { %v855_v58 = vmul.f32 0.125, %v784_v54  ;;  %v795_v9 = vrot.slane %v794_v63, 1  ;;  %v747_v10 = vadd.f32 %v731_v31, %v1632_v59  ;;  %v734_v11 = vmax.f32 %v700_v33, 0.0  ;;  %v1211_v12 = vpop.f32.mrb[22].mxu1 }
 0x361   :  { %v802_v60 = vadd.f32 %v801_v4, %v800_v52  ;;  %v810_v41 = vadd.f32 %v809_v57, %v748_v55  ;;  %v695_v61 = vadd.f32 %v1668_v1, %v694_v36  ;;  %v710_v62 = vadd.f32 %v1208_v50, %v1668_v1  ;;  %v714_v16 = vpop.f32.mrb[23].mxu1 }
 0x362   :  { %v890_v2 = vsel %vm889_vm3, %v855_v58, %v888_v3  ;;  %v796_v13 = vadd.f32 %v795_v9, %v794_v63  ;;  %v803_v39 = vrot.slane %v747_v10, 4  ;;  %v750_v19 = vadd.f32 %v734_v11, %v1646_v8 }
 0x363   :  { %v858_v20 = vmul.f32 0.125, %v802_v60  ;;  %v892_v21 = vsel %vm891_vm4, %v856_v0, %v890_v2  ;;  %v811_v22 = vrot.slane %v810_v41, 2  ;;  %v733_v59 = vmax.f32 %v695_v61, 0.0 }
 0x364   :  { %v857_v24 = vmul.f32 0.125, %v796_v13  ;;  %v804_v5 = vadd.f32 %v803_v39, %v747_v10  ;;  %v821_v6 = vrot.slane %v750_v19, 4  ;;  %v736_v26 = vmax.f32 %v710_v62, 0.0 }
 0x365   :  { %v812_v27 = vadd.f32 %v811_v22, %v810_v41  ;;  %v749_v28 = vadd.f32 %v733_v59, %v1642_v7  ;;  %v705_v29 = vadd.f32 %v1668_v1, %v704_v56  ;;  %v720_v30 = vadd.f32 %v1211_v12, %v1668_v1 }
 0x366   :  { %v894_v32 = vsel %vm893_vm5, %v857_v24, %v892_v21  ;;  %v805_v34 = vrot.slane %v804_v5, 2  ;;  %v822_v8 = vadd.f32 %v821_v6, %v750_v19  ;;  %v752_v49 = vadd.f32 %v736_v26, %v1656_v15 }
 0x367   :  { %v896_v35 = vsel %vm895_vm6, %v858_v20, %v894_v32  ;;  %v813_v36 = vrot.slane %v812_v27, 1  ;;  %v815_v37 = vrot.slane %v749_v28, 4  ;;  %v735_v47 = vmax.f32 %v705_v29, 0.0 }
 0x368   :  { %906 = vst [vmem:[%s1727_s5] sm:$0xff] %v896_v35  ;;  %v806_v7 = vadd.f32 %v805_v34, %v804_v5  ;;  %v823_v38 = vrot.slane %v822_v8, 2  ;;  %v833_v40 = vrot.slane %v752_v49, 4  ;;  %v738_v42 = vmax.f32 %v720_v30, 0.0 }
 0x369   :  { %v814_v25 = vadd.f32 %v813_v36, %v812_v27  ;;  %v816_v43 = vadd.f32 %v815_v37, %v749_v28  ;;  %v751_v44 = vadd.f32 %v735_v47, %v1652_v14  ;;  %v715_v23 = vadd.f32 %v1668_v1, %v714_v16 }
 0x36a   :  { %v807_v15 = vrot.slane %v806_v7, 1  ;;  %v824_v45 = vadd.f32 %v823_v38, %v822_v8  ;;  %v834_v46 = vadd.f32 %v833_v40, %v752_v49  ;;  %v754_v48 = vadd.f32 %v738_v42, %v1664_v18 }
 0x36b   :  { %v860_v50 = vmul.f32 0.125, %v814_v25  ;;  %v817_v51 = vrot.slane %v816_v43, 2  ;;  %v827_v52 = vrot.slane %v751_v44, 4  ;;  %v737_v55 = vmax.f32 %v715_v23, 0.0 }
 0x36c   :  { %v808_v33 = vadd.f32 %v807_v15, %v806_v7  ;;  %v825_v56 = vrot.slane %v824_v45, 1  ;;  %v835_v53 = vrot.slane %v834_v46, 2  ;;  %v845_v54 = vrot.slane %v754_v48, 4 }
 0x36d   :  { %v818_v63 = vadd.f32 %v817_v51, %v816_v43  ;;  %v828_v31 = vadd.f32 %v827_v52, %v751_v44  ;;  %v753_v0 = vadd.f32 %v737_v55, %v1661_v17 }
 0x36e   :  { %v859_v14 = vmul.f32 0.125, %v808_v33  ;;  %v836_v3 = vadd.f32 %v835_v53, %v834_v46  ;;  %v846_v1 = vadd.f32 %v845_v54, %v754_v48  ;;  %v826_v9 = vadd.f32 %v825_v56, %v824_v45 }
 0x36f   :  { %v819_v4 = vrot.slane %v818_v63, 1  ;;  %v829_v57 = vrot.slane %v828_v31, 2  ;;  %v839_v58 = vrot.slane %v753_v0, 4 }
 0x370   :  { %v897_v18 = vsel %vm883_vm0, %v860_v50, %v859_v14  ;;  %v837_v10 = vrot.slane %v836_v3, 1  ;;  %v847_v11 = vrot.slane %v846_v1, 2  ;;  %v862_v13 = vmul.f32 0.125, %v826_v9 }
 0x371   :  { %v820_v12 = vadd.f32 %v819_v4, %v818_v63  ;;  %v830_v60 = vadd.f32 %v829_v57, %v828_v31  ;;  %v840_v41 = vadd.f32 %v839_v58, %v753_v0 }
 0x372   :  { %v848_v61 = vadd.f32 %v847_v11, %v846_v1  ;;  %v838_v17 = vadd.f32 %v837_v10, %v836_v3 }
 0x373   :  { %v861_v62 = vmul.f32 0.125, %v820_v12  ;;  %v831_v16 = vrot.slane %v830_v60, 1  ;;  %v841_v2 = vrot.slane %v840_v41, 2 }
 0x374   :  { %v849_v39 = vrot.slane %v848_v61, 1  ;;  %v864_v5 = vmul.f32 0.125, %v838_v17 }
 0x375   :  { %v898_v19 = vsel %vm885_vm1, %v861_v62, %v897_v18  ;;  %v832_v20 = vadd.f32 %v831_v16, %v830_v60  ;;  %v842_v21 = vadd.f32 %v841_v2, %v840_v41 }
 0x376   :  { %v899_v22 = vsel %vm887_vm2, %v862_v13, %v898_v19  ;;  %v850_v6 = vadd.f32 %v849_v39, %v848_v61 }
 0x377   :  { %v863_v59 = vmul.f32 0.125, %v832_v20  ;;  %v843_v24 = vrot.slane %v842_v21, 1 }
 0x378   :  { %v866_v30 = vmul.f32 0.125, %v850_v6 }
 0x379   :  { %v900_v26 = vsel %vm889_vm3, %v863_v59, %v899_v22  ;;  %v844_v27 = vadd.f32 %v843_v24, %v842_v21 }
 0x37a   :  { %v901_v28 = vsel %vm891_vm4, %v864_v5, %v900_v26 }
 0x37b   :  { %v865_v29 = vmul.f32 0.125, %v844_v27 }
 0x37d   :  { %v902_v32 = vsel %vm893_vm5, %v865_v29, %v901_v28 }
 0x37e   :  { %v903_v34 = vsel %vm895_vm6, %v866_v30, %v902_v32 }
 0x37f   :  { %907 = vst [vmem:[%s1727_s5 + $0x8] sm:$0xff] %v903_v34 }
 0x380   :  { %912 = vsyncpa [#allocation3], 1 }
 0x381   :  { %913 = vsyncpa [#allocation5], 1 }

</bundles_post_ra>
